<compile_context>
chip_gen: v5e
topology: v5e:2x2
jax: 0.10.0
libtpu: 0.0.40
codegen_flags: <defaults>
</compile_context>

<pallas_src>
import functools

import jax
import jax.numpy as jnp
from jax import lax
from jax.experimental import pallas as pl
from jax.experimental.pallas import tpu as pltpu

NUM_TARGETS = 397  # len(BIRD_CODE)


def _round_up(x, m):
    return (x + m - 1) // m * m


# ----------------------------- Pallas kernel --------------------------------
def birdclef_kernel(patches_ref, convw_ref, convb_ref, fcw_ref, fcb_ref,
                    out_ref, acc_ref, *, bt, pt, p_valid, inv_p, mask_tail):
    # patches_ref: (Bt, Pt, Kp) bf16 -- im2col patches for Bt images, one P tile
    # convw_ref:   (Kp, C)      bf16 -- stem conv weight (Cin*kh*kw x Cout, padded)
    # convb_ref:   (1, C)       f32
    # fcw_ref:     (C, Npad)    bf16 -- FC weight, lane-padded to 512
    # fcb_ref:     (1, Npad)    f32
    # out_ref:     (Bt, Npad)   f32
    # acc_ref:     (Bt, C)      f32  -- running spatial sum of SiLU(conv) features
    p_idx = pl.program_id(1)

    @pl.when(p_idx == 0)
    def _init():
        acc_ref[...] = jnp.zeros_like(acc_ref)

    kp = patches_ref.shape[-1]
    cout = convw_ref.shape[-1]

    # Conv-as-matmul on the MXU (bf16 in, f32 accumulate); bias + SiLU in f32.
    patches = patches_ref[...].reshape(bt * pt, kp)
    feat = jnp.dot(patches, convw_ref[...], preferred_element_type=jnp.float32)
    feat = feat + convb_ref[...]
    feat = feat * jax.nn.sigmoid(feat)                       # SiLU (f32 VPU/EUP)
    feat = feat.reshape(bt, pt, cout)

    if mask_tail:
        # Zero rows that are spatial padding (only present in the last P tile).
        rows = lax.broadcasted_iota(jnp.int32, (1, pt, 1), 1) + p_idx * pt
        feat = jnp.where(rows < p_valid, feat, 0.0)

    acc_ref[...] += jnp.sum(feat, axis=1)                    # partial spatial sum

    @pl.when(p_idx == pl.num_programs(1) - 1)
    def _finalize():
        # AdaptiveAvgPool2d((1,1)) == mean over spatial positions (scale once).
        pooled = (acc_ref[...] * inv_p).astype(jnp.bfloat16)   # (Bt, C)
        # Dropout is identity at inference; FC as one lane-dense MXU matmul.
        logits = jnp.dot(pooled, fcw_ref[...],
                         preferred_element_type=jnp.float32)
        out_ref[...] = logits + fcb_ref[...]


# ------------------------------ wrapper --------------------------------------
def birdclef_forward(x_nchw, conv_w, conv_b, fc_w, fc_b, *, bt=8, pt_max=512):
    """x_nchw: (B, 3, H, W) float32.  Returns (B, NUM_TARGETS) float32."""
    B, Cin, H, W = x_nchw.shape
    Cout = conv_w.shape[0]
    K = Cin * 3 * 3
    Ho, Wo = (H + 1) // 2, (W + 1) // 2          # stride 2, pad 1, kernel 3
    P = Ho * Wo

    Kp = _round_up(K, 8)                          # 27 -> 32 (aligned vregs)
    Npad = _round_up(NUM_TARGETS, 128)            # 397 -> 512 (lane-dense out)
    Bt = bt
    B_pad = _round_up(B, Bt)
    Pt = _round_up(P, 8) if P <= pt_max else pt_max
    P_pad = _round_up(P, Pt)
    mask_tail = P_pad != P

    # im2col (glue, plain JAX). Feature order is (Cin, kh, kw), matching the
    # flattened PyTorch conv weight layout (Cout, Cin, kh, kw).
    patches = lax.conv_general_dilated_patches(
        x_nchw, filter_shape=(3, 3), window_strides=(2, 2),
        padding=((1, 1), (1, 1)))                      # (B, K, Ho, Wo)
    patches = patches.transpose(0, 2, 3, 1).reshape(B, P, K)
    patches = patches.astype(jnp.bfloat16)             # halve DMA bytes
    patches = jnp.pad(patches,
                      ((0, B_pad - B), (0, P_pad - P), (0, Kp - K)))

    convw = jnp.pad(conv_w.reshape(Cout, K).T.astype(jnp.bfloat16),
                    ((0, Kp - K), (0, 0)))             # (Kp, Cout)
    convb = conv_b.reshape(1, Cout).astype(jnp.float32)
    fcw = jnp.pad(fc_w.T.astype(jnp.bfloat16),
                  ((0, 0), (0, Npad - NUM_TARGETS)))   # (Cout, Npad)
    fcb = jnp.pad(fc_b.reshape(1, NUM_TARGETS).astype(jnp.float32),
                  ((0, 0), (0, Npad - NUM_TARGETS)))   # (1, Npad)

    kernel = functools.partial(
        birdclef_kernel, bt=Bt, pt=Pt, p_valid=P, inv_p=1.0 / P,
        mask_tail=mask_tail)

    grid_spec = pltpu.PrefetchScalarGridSpec(
        num_scalar_prefetch=0,
        grid=(B_pad // Bt, P_pad // Pt),               # batch parallel, P reduce
        in_specs=[
            pl.BlockSpec((Bt, Pt, Kp), lambda b, p: (b, p, 0)),
            pl.BlockSpec((Kp, Cout), lambda b, p: (0, 0)),
            pl.BlockSpec((1, Cout), lambda b, p: (0, 0)),
            pl.BlockSpec((Cout, Npad), lambda b, p: (0, 0)),
            pl.BlockSpec((1, Npad), lambda b, p: (0, 0)),
        ],
        out_specs=pl.BlockSpec((Bt, Npad), lambda b, p: (b, 0)),
        scratch_shapes=[pltpu.VMEM((Bt, Cout), jnp.float32)],
    )

    out_padded = pl.pallas_call(
        kernel,
        out_shape=jax.ShapeDtypeStruct((B_pad, Npad), jnp.float32),
        grid_spec=grid_spec,
        compiler_params=pltpu.CompilerParams(
            dimension_semantics=("parallel", "arbitrary"),
            vmem_limit_bytes=32 * 1024 * 1024),
    )(patches, convw, convb, fcw, fcb)

    return out_padded[:B, :NUM_TARGETS]


# --------------------------- reference (pure JAX) -----------------------------
def birdclef_reference(x_nchw, conv_w, conv_b, fc_w, fc_b):
    feat = lax.conv_general_dilated(
        x_nchw, conv_w, window_strides=(2, 2), padding=((1, 1), (1, 1)),
        dimension_numbers=("NCHW", "OIHW", "NCHW"))
    feat = feat + conv_b[None, :, None, None]
    feat = feat * jax.nn.sigmoid(feat)
    pooled = jnp.mean(feat, axis=(2, 3))              # (B, Cout)
    return pooled @ fc_w.T + fc_b


# ------------------------------- params ---------------------------------------
def xavier_uniform(key, shape, fan_in, fan_out):
    limit = jnp.sqrt(6.0 / (fan_in + fan_out))
    return jax.random.uniform(key, shape, jnp.float32, -limit, limit)


if __name__ == "__main__":
    key = jax.random.PRNGKey(0)
    k_x, k_conv, k_fc = jax.random.split(key, 3)

    # Small shapes consistent with the forward pass: batch=2, 3-channel "image".
    B, Cin, H, W = 2, 3, 16, 16
    Cout = 32  # stand-in for backbone in_features (1280 for efficientnet_b0)

    x = jax.random.normal(k_x, (B, Cin, H, W), jnp.float32)

    # Stem conv params (deterministic).
    conv_w = xavier_uniform(k_conv, (Cout, Cin, 3, 3),
                            fan_in=Cin * 9, fan_out=Cout * 9)
    conv_b = jnp.zeros((Cout,), jnp.float32)

    # self.fc = nn.Linear(in_features, NUM_TARGETS) with xavier_uniform_ weight
    # and zero bias (init_layer).
    fc_w = xavier_uniform(k_fc, (NUM_TARGETS, Cout),
                          fan_in=Cout, fan_out=NUM_TARGETS)
    fc_b = jnp.zeros((NUM_TARGETS,), jnp.float32)

    out = birdclef_forward(x, conv_w, conv_b, fc_w, fc_b)
    out = jax.block_until_ready(out)

    ref = birdclef_reference(x, conv_w, conv_b, fc_w, fc_b)
    assert out.shape == (B, NUM_TARGETS)
    # bf16 MXU inputs -> bf16-appropriate tolerance vs the f32 reference.
    assert jnp.allclose(out, ref, atol=3e-2, rtol=3e-2)

    print("KERNEL_OK")
</pallas_src>

<mosaic_0001>
module attributes {stable_mosaic.version = 11 : i64} {
  func.func @birdclef_kernel(%arg0: i32, %arg1: i32, %arg2: memref<8x64x32xbf16, #tpu.memory_space<vmem>>, %arg3: memref<32x32xbf16, #tpu.memory_space<vmem>>, %arg4: memref<1x32xf32, #tpu.memory_space<vmem>>, %arg5: memref<32x512xbf16, #tpu.memory_space<vmem>>, %arg6: memref<1x512xf32, #tpu.memory_space<vmem>>, %arg7: memref<8x512xf32, #tpu.memory_space<vmem>>, %arg8: memref<8x32xf32, #tpu.memory_space<vmem>>) attributes {dimension_semantics = [#tpu.dimension_semantics<parallel>, #tpu.dimension_semantics<arbitrary>], iteration_bounds = array<i64: 1, 1>, scalar_prefetch = 0 : i64, scratch_operands = 1 : i64, tpu.core_type = #tpu.core_type<tc>, window_params = [{transform_indices = @transform_0, window_bounds = array<i64: 8, 64, 32>}, {pipeline_mode = #tpu.pipeline_mode<synchronous>, transform_indices = @transform_1, window_bounds = array<i64: 32, 32>}, {pipeline_mode = #tpu.pipeline_mode<synchronous>, transform_indices = @transform_2, window_bounds = array<i64: 1, 32>}, {pipeline_mode = #tpu.pipeline_mode<synchronous>, transform_indices = @transform_3, window_bounds = array<i64: 32, 512>}, {pipeline_mode = #tpu.pipeline_mode<synchronous>, transform_indices = @transform_4, window_bounds = array<i64: 1, 512>}, {transform_indices = @transform_5, window_bounds = array<i64: 8, 512>}]} {
    %c0_i32 = arith.constant 0 : i32
    %0 = arith.cmpi eq, %arg1, %c0_i32 : i32
    %1 = arith.extui %0 : i1 to i32
    %c0_i32_0 = arith.constant 0 : i32
    %2 = arith.cmpi ne, %1, %c0_i32_0 : i32
    scf.if %2 {
      %cst_15 = arith.constant 0.000000e+00 : f32
      %24 = vector.broadcast %cst_15 : f32 to vector<8x32xf32>
      %c0_16 = arith.constant 0 : index
      %c0_17 = arith.constant 0 : index
      %25 = vector.load %arg8[%c0_16, %c0_17] : memref<8x32xf32, #tpu.memory_space<vmem>>, vector<8x32xf32>
      tpu.vector_store %arg8[%c0_16, %c0_17], %24 {strides = array<i32>} : memref<8x32xf32, #tpu.memory_space<vmem>>, vector<8x32xf32>,
    } else {
    }
    %c0 = arith.constant 0 : index
    %c0_1 = arith.constant 0 : index
    %c0_2 = arith.constant 0 : index
    %3 = vector.load %arg2[%c0, %c0_1, %c0_2] : memref<8x64x32xbf16, #tpu.memory_space<vmem>>, vector<8x64x32xbf16>
    %4 = vector.shape_cast %3 : vector<8x64x32xbf16> to vector<512x32xbf16>
    %c0_3 = arith.constant 0 : index
    %c0_4 = arith.constant 0 : index
    %5 = vector.load %arg3[%c0_3, %c0_4] : memref<32x32xbf16, #tpu.memory_space<vmem>>, vector<32x32xbf16>
    %cst = arith.constant dense<0.000000e+00> : vector<512x32xf32>
    %6 = tpu.matmul %4, %5, %cst {dimension_numbers = #tpu.dot_dimension_numbers<[1], [0], [0], [1], [0, 0, 1, 1], [], []>} : vector<512x32xbf16>, vector<32x32xbf16>, vector<512x32xf32> -> vector<512x32xf32>
    %c0_5 = arith.constant 0 : index
    %c0_6 = arith.constant 0 : index
    %7 = vector.load %arg4[%c0_5, %c0_6] : memref<1x32xf32, #tpu.memory_space<vmem>>, vector<1x32xf32>
    %8 = vector.broadcast %7 : vector<1x32xf32> to vector<512x32xf32>
    %9 = arith.addf %6, %8 : vector<512x32xf32>
    %10 = arith.negf %9 : vector<512x32xf32>
    %11 = math.exp %10 : vector<512x32xf32>
    %cst_7 = arith.constant 1.000000e+00 : f32
    %12 = vector.broadcast %cst_7 : f32 to vector<512x32xf32>
    %13 = arith.addf %12, %11 : vector<512x32xf32>
    %14 = arith.divf %12, %13 : vector<512x32xf32>
    %15 = arith.mulf %9, %14 : vector<512x32xf32>
    %16 = vector.shape_cast %15 : vector<512x32xf32> to vector<8x64x32xf32>
    %c0_8 = arith.constant 0 : index
    %c0_9 = arith.constant 0 : index
    %17 = vector.load %arg8[%c0_8, %c0_9] : memref<8x32xf32, #tpu.memory_space<vmem>>, vector<8x32xf32>
    %cst_10 = arith.constant dense<0.000000e+00> : vector<8x32xf32>
    %18 = vector.multi_reduction <add>, %16, %cst_10 [1] : vector<8x64x32xf32> to vector<8x32xf32>
    %19 = arith.addf %17, %18 : vector<8x32xf32>
    %c0_11 = arith.constant 0 : index
    %c0_12 = arith.constant 0 : index
    %20 = vector.load %arg8[%c0_11, %c0_12] : memref<8x32xf32, #tpu.memory_space<vmem>>, vector<8x32xf32>
    tpu.vector_store %arg8[%c0_11, %c0_12], %19 {strides = array<i32>} : memref<8x32xf32, #tpu.memory_space<vmem>>, vector<8x32xf32>,
    %c0_i32_13 = arith.constant 0 : i32
    %21 = arith.cmpi eq, %arg1, %c0_i32_13 : i32
    %22 = arith.extui %21 : i1 to i32
    %c0_i32_14 = arith.constant 0 : i32
    %23 = arith.cmpi ne, %22, %c0_i32_14 : i32
    scf.if %23 {
      %c0_15 = arith.constant 0 : index
      %c0_16 = arith.constant 0 : index
      %24 = vector.load %arg8[%c0_15, %c0_16] : memref<8x32xf32, #tpu.memory_space<vmem>>, vector<8x32xf32>
      %cst_17 = arith.constant 1.562500e-02 : f32
      %25 = vector.broadcast %cst_17 : f32 to vector<8x32xf32>
      %26 = arith.mulf %24, %25 : vector<8x32xf32>
      %27 = arith.truncf %26 : vector<8x32xf32> to vector<8x32xbf16>
      %c0_18 = arith.constant 0 : index
      %c0_19 = arith.constant 0 : index
      %28 = vector.load %arg5[%c0_18, %c0_19] : memref<32x512xbf16, #tpu.memory_space<vmem>>, vector<32x512xbf16>
      %cst_20 = arith.constant dense<0.000000e+00> : vector<8x512xf32>
      %29 = tpu.matmul %27, %28, %cst_20 {dimension_numbers = #tpu.dot_dimension_numbers<[1], [0], [0], [1], [0, 0, 1, 1], [], []>} : vector<8x32xbf16>, vector<32x512xbf16>, vector<8x512xf32> -> vector<8x512xf32>
      %c0_21 = arith.constant 0 : index
      %c0_22 = arith.constant 0 : index
      %30 = vector.load %arg6[%c0_21, %c0_22] : memref<1x512xf32, #tpu.memory_space<vmem>>, vector<1x512xf32>
      %31 = vector.broadcast %30 : vector<1x512xf32> to vector<8x512xf32>
      %32 = arith.addf %29, %31 : vector<8x512xf32>
      %c0_23 = arith.constant 0 : index
      %c0_24 = arith.constant 0 : index
      %33 = vector.load %arg7[%c0_23, %c0_24] : memref<8x512xf32, #tpu.memory_space<vmem>>, vector<8x512xf32>
      tpu.vector_store %arg7[%c0_23, %c0_24], %32 {strides = array<i32>} : memref<8x512xf32, #tpu.memory_space<vmem>>, vector<8x512xf32>,
    } else {
    }
    return
  }
  func.func @transform_0(%arg0: i32, %arg1: i32) -> (i32, i32, i32) {
    %c0_i32 = arith.constant 0 : i32
    %c0_i32_0 = arith.constant 0 : i32
    return %arg0, %arg1, %c0_i32 : i32, i32, i32
  }
  func.func @transform_1(%arg0: i32, %arg1: i32) -> (i32, i32) {
    %c0_i32 = arith.constant 0 : i32
    %c0_i32_0 = arith.constant 0 : i32
    %c0_i32_1 = arith.constant 0 : i32
    return %c0_i32, %c0_i32_0 : i32, i32
  }
  func.func @transform_2(%arg0: i32, %arg1: i32) -> (i32, i32) {
    %c0_i32 = arith.constant 0 : i32
    %c0_i32_0 = arith.constant 0 : i32
    %c0_i32_1 = arith.constant 0 : i32
    return %c0_i32, %c0_i32_0 : i32, i32
  }
  func.func @transform_3(%arg0: i32, %arg1: i32) -> (i32, i32) {
    %c0_i32 = arith.constant 0 : i32
    %c0_i32_0 = arith.constant 0 : i32
    %c0_i32_1 = arith.constant 0 : i32
    return %c0_i32, %c0_i32_0 : i32, i32
  }
  func.func @transform_4(%arg0: i32, %arg1: i32) -> (i32, i32) {
    %c0_i32 = arith.constant 0 : i32
    %c0_i32_0 = arith.constant 0 : i32
    %c0_i32_1 = arith.constant 0 : i32
    return %c0_i32, %c0_i32_0 : i32, i32
  }
  func.func @transform_5(%arg0: i32, %arg1: i32) -> (i32, i32) {
    %c0_i32 = arith.constant 0 : i32
    %c0_i32_0 = arith.constant 0 : i32
    return %arg0, %c0_i32 : i32, i32
  }
}

</mosaic_0001>

<bundles_post_ra>
// kernel: tpu_custom_call.1
= control target key start
LH: loop header
LB: loop body
LE: loop exit
PB: predicated region body
PF: predicated region fallthrough
CT: control target
= control target key end

     0   :  { %s5042_s0 = inlined_call_operand.vmem [shape: bf16[8,64,32], index: 0, kind: input, shape index: {}]   ;;  %s5043_s1 = inlined_call_operand.vmem [shape: bf16[32,32], index: 1, kind: input, shape index: {}]   ;;  %s5044_s2 = inlined_call_operand.vmem [shape: f32[1,32], index: 2, kind: input, shape index: {}]   ;;  %s5045_s3 = inlined_call_operand.vmem [shape: bf16[32,512], index: 3, kind: input, shape index: {}]   ;;  %s5046_s4 = inlined_call_operand.vmem [shape: f32[1,512], index: 4, kind: input, shape index: {}]   ;;  %s5047_s5 = inlined_call_operand.hbm [shape: f32[8,512], index: 5, kind: output, shape index: {}]  }
   0x1   :  { %v2452_v0 = vld [vmem:[%s5043_s1 + $0x8] sm:$0xff]  ;;  %v2451_v1 = vld [vmem:[%s5043_s1] sm:$0xff] }
   0x2   :  { %375 = vmatpush.bf16.msra.mxu0 %v2452_v0  ;;  %2461 = vmatpush.bf16.msra.mxu1 %v2452_v0 }
   0x3   :  { %2462 = vmatpush.bf16.msra.mxu2 %v2452_v0  ;;  %2463 = vmatpush.bf16.msra.mxu3 %v2452_v0 }
   0x4   :  { %10 = vsyncpa [#allocation4], 0  ;;  %v2419_v2 = vld [vmem:[%s5042_s0] sm:$0xff]  ;;  %v2428_v3 = vld [vmem:[%s5042_s0 + $0x48] sm:$0xff]  ;;  %vm26_vm0 = vcmask 261120   ;;  %s2755_s18 = smov [#allocation3]  }
   0x5   :  { %v2435_v4 = vld [vmem:[%s5042_s0 + $0x80] sm:$0xff]  ;;  %v2420_v6 = vld [vmem:[%s5042_s0 + $0x8] sm:$0xff]  ;;  %v2429_v7 = vld [vmem:[%s5042_s0 + $0x50] sm:$0xff]  ;;  %s2140_s19 = sshll.u32 %s2755_s18, 4  ;;  %s2141_s19 = int_to_ptr.vmem [resolvable:$true] %s2140_s19 }
   0x6   :  { %376 = vmatpush.bf16.msra.mxu0 %v2451_v1  ;;  %2464 = vmatpush.bf16.msra.mxu1 %v2451_v1  ;;  %v2443_v5 = vld [vmem:[%s5042_s0 + $0xc0] sm:$0xff]  ;;  %v2436_v8 = vld [vmem:[%s5042_s0 + $0x88] sm:$0xff]  ;;  %v2421_v10 = vld [vmem:[%s5042_s0 + $0x10] sm:$0xff] }
   0x7   :  { %2465 = vmatpush.bf16.msra.mxu2 %v2451_v1  ;;  %2466 = vmatpush.bf16.msra.mxu3 %v2451_v1  ;;  %v2444_v9 = vld [vmem:[%s5042_s0 + $0xc8] sm:$0xff]  ;;  %v2430_v11 = vld [vmem:[%s5042_s0 + $0x58] sm:$0xff]  ;;  %v2437_v12 = vld [vmem:[%s5042_s0 + $0x90] sm:$0xff] }
   0x8   :  { %v2445_v13 = vld [vmem:[%s5042_s0 + $0xd0] sm:$0xff]  ;;  %v2422_v14 = vld [vmem:[%s5042_s0 + $0x18] sm:$0xff]  ;;  %v2431_v15 = vld [vmem:[%s5042_s0 + $0x60] sm:$0xff] }
   0x9   :  { %2287 = vmatmul.msk.bf16.vlgmr.msra.gmra.mxu0 %vm26_vm0, %v2419_v2  ;;  %2296 = vmatmul.msk.bf16.vlgmr.msra.gmra.mxu1 %vm26_vm0, %v2428_v3  ;;  %v2438_v16 = vld [vmem:[%s5042_s0 + $0x98] sm:$0xff]  ;;  %v2423_v18 = vld [vmem:[%s5042_s0 + $0x20] sm:$0xff]  ;;  %v2432_v19 = vld [vmem:[%s5042_s0 + $0x68] sm:$0xff] }
   0xa   :  { %2303 = vmatmul.msk.bf16.vlgmr.msra.gmra.mxu2 %vm26_vm0, %v2435_v4  ;;  %2311 = vmatmul.msk.bf16.vlgmr.msra.gmra.mxu3 %vm26_vm0, %v2443_v5  ;;  %v2446_v17 = vld [vmem:[%s5042_s0 + $0xd8] sm:$0xff]  ;;  %v2439_v20 = vld [vmem:[%s5042_s0 + $0xa0] sm:$0xff]  ;;  %v2424_v22 = vld [vmem:[%s5042_s0 + $0x28] sm:$0xff] }
   0xb   :  { %v2447_v21 = vld [vmem:[%s5042_s0 + $0xe0] sm:$0xff]  ;;  %v2433_v23 = vld [vmem:[%s5042_s0 + $0x70] sm:$0xff]  ;;  %v2440_v24 = vld [vmem:[%s5042_s0 + $0xa8] sm:$0xff] }
   0xc   :  { %v2448_v25 = vld [vmem:[%s5042_s0 + $0xe8] sm:$0xff]  ;;  %v2425_v26 = vld [vmem:[%s5042_s0 + $0x30] sm:$0xff]  ;;  %v2434_v27 = vld [vmem:[%s5042_s0 + $0x78] sm:$0xff] }
   0xd   :  { %v2441_v28 = vld [vmem:[%s5042_s0 + $0xb0] sm:$0xff]  ;;  %v2426_v30 = vld [vmem:[%s5042_s0 + $0x38] sm:$0xff]  ;;  %v2919_v33 = vld [vmem:[%s5044_s2] ss:$0 sm:$0xff] }
   0xe   :  { %v2449_v29 = vld [vmem:[%s5042_s0 + $0xf0] sm:$0xff]  ;;  %v2442_v31 = vld [vmem:[%s5042_s0 + $0xb8] sm:$0xff]  ;;  %v2427_v34 = vld [vmem:[%s5042_s0 + $0x40] sm:$0xff] }
   0xf   :  { %v2450_v32 = vld [vmem:[%s5042_s0 + $0xf8] sm:$0xff] }
  0x19   :  { %2288 = vmatmul.msk.bf16.gmra.mxu0 %vm26_vm0, %v2420_v6  ;;  %2297 = vmatmul.msk.bf16.gmra.mxu1 %vm26_vm0, %v2429_v7 }
  0x1a   :  { %2304 = vmatmul.msk.bf16.gmra.mxu2 %vm26_vm0, %v2436_v8  ;;  %2312 = vmatmul.msk.bf16.gmra.mxu3 %vm26_vm0, %v2444_v9 }
  0x29   :  { %2289 = vmatmul.msk.bf16.gmra.mxu0 %vm26_vm0, %v2421_v10  ;;  %2298 = vmatmul.msk.bf16.gmra.mxu1 %vm26_vm0, %v2430_v11 }
  0x2a   :  { %2305 = vmatmul.msk.bf16.gmra.mxu2 %vm26_vm0, %v2437_v12  ;;  %2313 = vmatmul.msk.bf16.gmra.mxu3 %vm26_vm0, %v2445_v13 }
  0x39   :  { %2290 = vmatmul.msk.bf16.gmra.mxu0 %vm26_vm0, %v2422_v14  ;;  %2299 = vmatmul.msk.bf16.gmra.mxu1 %vm26_vm0, %v2431_v15 }
  0x3a   :  { %2306 = vmatmul.msk.bf16.gmra.mxu2 %vm26_vm0, %v2438_v16  ;;  %2314 = vmatmul.msk.bf16.gmra.mxu3 %vm26_vm0, %v2446_v17 }
  0x49   :  { %2291 = vmatmul.msk.bf16.gmra.mxu0 %vm26_vm0, %v2423_v18  ;;  %2300 = vmatmul.msk.bf16.gmra.mxu1 %vm26_vm0, %v2432_v19 }
  0x4a   :  { %2307 = vmatmul.msk.bf16.gmra.mxu2 %vm26_vm0, %v2439_v20  ;;  %2315 = vmatmul.msk.bf16.gmra.mxu3 %vm26_vm0, %v2447_v21 }
  0x59   :  { %2292 = vmatmul.msk.bf16.gmra.mxu0 %vm26_vm0, %v2424_v22  ;;  %2301 = vmatmul.msk.bf16.gmra.mxu1 %vm26_vm0, %v2433_v23 }
  0x5a   :  { %2308 = vmatmul.msk.bf16.gmra.mxu2 %vm26_vm0, %v2440_v24  ;;  %2316 = vmatmul.msk.bf16.gmra.mxu3 %vm26_vm0, %v2448_v25 }
  0x69   :  { %2293 = vmatmul.msk.bf16.gmra.mxu0 %vm26_vm0, %v2425_v26  ;;  %2302 = vmatmul.msk.bf16.gmra.mxu1 %vm26_vm0, %v2434_v27 }
  0x6a   :  { %2309 = vmatmul.msk.bf16.gmra.mxu2 %vm26_vm0, %v2441_v28  ;;  %2317 = vmatmul.msk.bf16.gmra.mxu3 %vm26_vm0, %v2449_v29 }
  0x79   :  { %2294 = vmatmul.msk.bf16.gmra.mxu0 %vm26_vm0, %v2426_v30 }
  0x7a   :  { %2310 = vmatmul.msk.bf16.gmra.mxu2 %vm26_vm0, %v2442_v31  ;;  %2318 = vmatmul.msk.bf16.gmra.mxu3 %vm26_vm0, %v2450_v32 }
  0x86   :  { %v378_v35 = vpop.f32.mrf.mxu0 }
  0x87   :  { %v2925_v36 = vadd.f32 %v2919_v33, %v378_v35 }
  0x89   :  { %v2319_v37 = vmul.f32 -1.442695, %v2925_v36  ;;  %2295 = vmatmul.msk.bf16.gmra.mxu0 %vm26_vm0, %v2427_v34 }
  0x8b   :  { %2470 = vpow2.f32 %v2319_v37 }
  0x8d   :  { %v458_v38 = vpop.f32.mrf.mxu2  ;;  %v498_v39 = vpop.f32.mrf.mxu3 }
  0x8e   :  { %v2930_v40 = vadd.f32 %v2919_v33, %v458_v38  ;;  %v2933_v41 = vadd.f32 %v2919_v33, %v498_v39  ;;  %v380_v42 = vpop.f32.mrf.mxu0 }
  0x8f   :  { %v2936_v43 = vadd.f32 %v2919_v33, %v380_v42 }
  0x90   :  { %v2351_v44 = vmul.f32 -1.442695, %v2930_v40  ;;  %v2367_v45 = vmul.f32 -1.442695, %v2933_v41 }
  0x91   :  { %v2471_v46 = vpop.eup %2470  ;;  %v2320_v48 = vmul.f32 -1.442695, %v2936_v43 }
  0x92   :  { %v730_v47 = vadd.f32 1.0, %v2471_v46  ;;  %2472 = vpow2.f32 %v2351_v44 }
  0x93   :  { %2474 = vpow2.f32 %v2367_v45 }
  0x94   :  { %2476 = vrcp.f32 %v730_v47  ;;  %v803_v5 = vand.u32 2147483647, %v730_v47  ;;  %v805_v6 = vand.u32 2147483648, %v730_v47  ;;  %vm799_vm2 = vweird.f32 %v730_v47 }
  0x95   :  { %v460_v49 = vpop.f32.mrf.mxu2  ;;  %v500_v50 = vpop.f32.mrf.mxu3  ;;  %2478 = vpow2.f32 %v2320_v48 }
  0x96   :  { %v2942_v51 = vadd.f32 %v2919_v33, %v460_v49  ;;  %v2945_v53 = vadd.f32 %v2919_v33, %v500_v50  ;;  %v383_v7 = vpop.f32.mrf.mxu0  ;;  %vm804_vm4 = vcmp.eq.f32.partialorder %v803_v5, 8.507059e+37  ;;  %v806_v18 = vor.u32 1.1754944e-38, %v805_v6 }
  0x97   :  { %v2970_v16 = vadd.f32 %v2919_v33, %v383_v7 }
  0x98   :  { %v2473_v52 = vpop.eup %2472  ;;  %v2352_v58 = vmul.f32 -1.442695, %v2942_v51  ;;  %v2368_v61 = vmul.f32 -1.442695, %v2945_v53 }
  0x99   :  { %v2475_v54 = vpop.eup %2474  ;;  %v762_v55 = vadd.f32 1.0, %v2473_v52  ;;  %v2321_v29 = vmul.f32 -1.442695, %v2970_v16 }
  0x9a   :  { %v2477_v56 = vpop.eup %2476  ;;  %v2947_v57 = vadd.f32 1.0, %v2475_v54 }
  0x9b   :  { %v795_v59 = vmul.f32 %v2477_v56, %v730_v47  ;;  %2480 = vrcp.f32 %v762_v55  ;;  %v2479_v60 = vpop.eup %2478  ;;  %vm800_vm1 = vweird.f32 %v2477_v56  ;;  %vm1279_vm5 = vweird.f32 %v762_v55 }
  0x9c   :  { %2482 = vrcp.f32 %v2947_v57  ;;  %v2952_v0 = vadd.f32 1.0, %v2479_v60  ;;  %vm2962_vm3 = vmor %vm799_vm2, %vm800_vm1  ;;  %v1283_v20 = vand.u32 2147483647, %v762_v55  ;;  %v1285_v21 = vand.u32 2147483648, %v762_v55 }
  0x9d   :  { %v796_v62 = vsub.f32 1.0, %v795_v59  ;;  %2484 = vpow2.f32 %v2352_v58  ;;  %v1523_v27 = vand.u32 2147483647, %v2947_v57  ;;  %vm1519_vm8 = vweird.f32 %v2947_v57  ;;  %v463_v34 = vpop.f32.mrf.mxu2  ;;  %v503_v58 = vpop.f32.mrf.mxu3 }
  0x9e   :  { %2486 = vpow2.f32 %v2368_v61  ;;  %v1525_v31 = vand.u32 2147483648, %v2947_v57  ;;  %v820_v32 = vand.u32 2147483648, %v2952_v0  ;;  %v818_v38 = vand.u32 2147483647, %v2952_v0  ;;  %v385_v7 = vpop.f32.mrf.mxu0 }
  0x9f   :  { %v797_v63 = vmul.f32 %v2477_v56, %v796_v62  ;;  %2488 = vrcp.f32 %v2952_v0  ;;  %vm2990_vm11 = vcmp.eq.f32.partialorder %v1283_v20, 8.507059e+37  ;;  %v1286_v42 = vor.u32 1.1754944e-38, %v1285_v21 }
  0xa0   :  { %vm3003_vm13 = vcmp.eq.f32.partialorder %v1523_v27, 8.507059e+37  ;;  %vm814_vm14 = vweird.f32 %v2952_v0  ;;  %v1526_v49 = vor.u32 1.1754944e-38, %v1525_v31  ;;  %v821_v50 = vor.u32 1.1754944e-38, %v820_v32 }
  0xa1   :  { %v2954_v1 = vpop.eup %2480  ;;  %v798_v2 = vadd.f32 %v2477_v56, %v797_v63  ;;  %vm819_vm1 = vcmp.eq.f32.partialorder %v818_v38, 8.507059e+37  ;;  %v3023_v5 = vadd.f32 %v2919_v33, %v503_v58  ;;  %v3043_v20 = vadd.f32 %v2919_v33, %v385_v7  ;;  %v423_v58 = vpop.f32.mrf.mxu1 }
  0xa2   :  { %v1275_v3 = vmul.f32 %v2954_v1, %v762_v55  ;;  %v2958_v4 = vpop.eup %2482  ;;  %vm1280_vm6 = vweird.f32 %v2954_v1 }
  0xa3   :  { %v2485_v8 = vpop.eup %2484  ;;  %v1515_v10 = vmul.f32 %v2958_v4, %v2947_v57  ;;  %v802_v13 = vsel %vm2962_vm3, %v2477_v56, %v798_v2  ;;  %vm2980_vm7 = vmor %vm1279_vm5, %vm1280_vm6  ;;  %vm1520_vm9 = vweird.f32 %v2958_v4 }
  0xa4   :  { %v1276_v9 = vsub.f32 1.0, %v1275_v3  ;;  %v2487_v12 = vpop.eup %2486  ;;  %v763_v19 = vadd.f32 1.0, %v2485_v8  ;;  %v807_v23 = vsel %vm804_vm4, %v806_v18, %v802_v13  ;;  %vm2999_vm12 = vmor %vm1519_vm8, %vm1520_vm9  ;;  %v3020_v3 = vadd.f32 %v2919_v33, %v463_v34 }
  0xa5   :  { %v1516_v15 = vsub.f32 1.0, %v1515_v10  ;;  %v2489_v17 = vpop.eup %2488  ;;  %v2975_v25 = vadd.f32 1.0, %v2487_v12  ;;  %v1754_v35 = vmul.f32 %v807_v23, %v2925_v36  ;;  %v465_v13 = vpop.f32.mrf.mxu2 }
  0xa6   :  { %v1277_v14 = vmul.f32 %v2954_v1, %v1276_v9  ;;  %v810_v22 = vmul.f32 %v2489_v17, %v2952_v0  ;;  %2490 = vrcp.f32 %v763_v19  ;;  %vm815_vm10 = vweird.f32 %v2489_v17 }
  0xa7   :  { %v1517_v24 = vmul.f32 %v2958_v4, %v1516_v15  ;;  %2492 = vrcp.f32 %v2975_v25  ;;  %vm816_vm15 = vmor %vm814_vm14, %vm815_vm10  ;;  %v1298_v52 = vand.u32 2147483647, %v763_v19  ;;  %v1300_v54 = vand.u32 2147483648, %v763_v19 }
  0xa8   :  { %v1278_v26 = vadd.f32 %v2954_v1, %v1277_v14  ;;  %v811_v28 = vsub.f32 1.0, %v810_v22  ;;  %v1819_v55 = vsel %vm26_vm0, %v1754_v35, 0.0  ;;  %vm1294_vm2 = vweird.f32 %v763_v19 }
  0xa9   :  { %v1518_v44 = vadd.f32 %v2958_v4, %v1517_v24  ;;  %2494 = vpow2.f32 %v2321_v29  ;;  %vm3015_vm4 = vcmp.eq.f32.partialorder %v1298_v52, 8.507059e+37  ;;  %v1301_v2 = vor.u32 1.1754944e-38, %v1300_v54 }
  0xaa   :  { %v812_v37 = vmul.f32 %v2489_v17, %v811_v28  ;;  %v1282_v45 = vsel %vm2980_vm7, %v2954_v1, %v1278_v26  ;;  %vm1534_vm5 = vweird.f32 %v2975_v25  ;;  %v1538_v10 = vand.u32 2147483647, %v2975_v25 }
  0xab   :  { %v1287_v59 = vsel %vm2990_vm11, %v1286_v42, %v1282_v45  ;;  %v1522_v60 = vsel %vm2999_vm12, %v2958_v4, %v1518_v44  ;;  %v1540_v11 = vand.u32 2147483648, %v2975_v25  ;;  %v2353_v12 = vmul.f32 -1.442695, %v3020_v3 }
  0xac   :  { %v813_v47 = vadd.f32 %v2489_v17, %v812_v37  ;;  %v2491_v48 = vpop.eup %2490  ;;  %v1786_v18 = vmul.f32 %v1287_v59, %v2930_v40  ;;  %v3048_v24 = vadd.f32 %v2919_v33, %v465_v13  ;;  %v2322_v29 = vmul.f32 -1.442695, %v3043_v20 }
  0xad   :  { %v1290_v57 = vmul.f32 %v2491_v48, %v763_v19  ;;  %vm1295_vm3 = vweird.f32 %v2491_v48  ;;  %v2493_v0 = vpop.eup %2492  ;;  %v1527_v19 = vsel %vm3003_vm13, %v1526_v49, %v1522_v60  ;;  %2496 = vpow2.f32 %v2353_v12 }
  0xae   :  { %v817_v56 = vsel %vm816_vm15, %v2489_v17, %v813_v47  ;;  %vm3031_vm6 = vmor %vm1294_vm2, %vm1295_vm3  ;;  %vm1535_vm7 = vweird.f32 %v2493_v0  ;;  %v2369_v17 = vmul.f32 -1.442695, %v3023_v5  ;;  %v1541_v27 = vor.u32 1.1754944e-38, %v1540_v11 }
  0xaf   :  { %v822_v61 = vsel %vm819_vm1, %v821_v50, %v817_v56  ;;  %v1291_v63 = vsub.f32 1.0, %v1290_v57  ;;  %v2495_v21 = vpop.eup %2494  ;;  %vm3054_vm8 = vmor %vm1534_vm5, %vm1535_vm7  ;;  %vm1539_vm9 = vcmp.eq.f32.partialorder %v1538_v10, 8.507059e+37  ;;  %v1903_v32 = vsel %vm26_vm0, %v1786_v18, 0.0  ;;  %v505_v56 = vpop.f32.mrf.mxu3 }
  0xb0   :  { %v1755_v62 = vmul.f32 %v822_v61, %v2936_v43  ;;  %v1530_v43 = vmul.f32 %v2493_v0, %v2975_v25  ;;  %2498 = vpow2.f32 %v2369_v17  ;;  %v732_v28 = vadd.f32 1.0, %v2495_v21 }
  0xb1   :  { %v1292_v6 = vmul.f32 %v2491_v48, %v1291_v63  ;;  %v1802_v34 = vmul.f32 %v1527_v19, %v2933_v41  ;;  %v2354_v37 = vmul.f32 -1.442695, %v3048_v24  ;;  %v3080_v61 = vadd.f32 %v2919_v33, %v423_v58 }
  0xb2   :  { %v1820_v4 = vsel %vm26_vm0, %v1755_v62, 0.0  ;;  %v1531_v15 = vsub.f32 1.0, %v1530_v43  ;;  %2500 = vrcp.f32 %v732_v28  ;;  %v833_v52 = vand.u32 2147483647, %v732_v28 }
  0xb3   :  { %v3028_v8 = vadd.f32 %v1820_v4, %v1819_v55  ;;  %v1293_v14 = vadd.f32 %v2491_v48, %v1292_v6  ;;  %2502 = vpow2.f32 %v2322_v29  ;;  %v2497_v38 = vpop.eup %2496  ;;  %v1945_v41 = vsel %vm26_vm0, %v1802_v34, 0.0 }
  0xb4   :  { %v1532_v23 = vmul.f32 %v2493_v0, %v1531_v15  ;;  %v764_v45 = vadd.f32 1.0, %v2497_v38  ;;  %2504 = vpow2.f32 %v2354_v37  ;;  %v835_v55 = vand.u32 2147483648, %v732_v28 }
  0xb5   :  { %v1297_v22 = vsel %vm3031_vm6, %v2491_v48, %v1293_v14  ;;  %vm829_vm11 = vweird.f32 %v732_v28  ;;  %vm3082_vm12 = vcmp.eq.f32.partialorder %v833_v52, 8.507059e+37  ;;  %v3087_v63 = vadd.f32 %v2919_v33, %v505_v56 }
  0xb6   :  { %v1302_v26 = vsel %vm3015_vm4, %v1301_v2, %v1297_v22  ;;  %v1533_v31 = vadd.f32 %v2493_v0, %v1532_v23  ;;  %2506 = vrcp.f32 %v764_v45  ;;  %v836_v1 = vor.u32 1.1754944e-38, %v835_v55 }
  0xb7   :  { %v1787_v30 = vmul.f32 %v1302_v26, %v2942_v51  ;;  %v2499_v51 = vpop.eup %2498  ;;  %vm1309_vm14 = vweird.f32 %v764_v45  ;;  %v1313_v43 = vand.u32 2147483647, %v764_v45  ;;  %v1315_v7 = vand.u32 2147483648, %v764_v45 }
  0xb8   :  { %v1537_v25 = vsel %vm3054_vm8, %v2493_v0, %v1533_v31  ;;  %v3069_v46 = vadd.f32 1.0, %v2499_v51  ;;  %v2501_v47 = vpop.eup %2500 }
  0xb9   :  { %v1904_v35 = vsel %vm26_vm0, %v1787_v30, 0.0  ;;  %v1542_v42 = vsel %vm1539_vm9, %v1541_v27, %v1537_v25  ;;  %v2503_v49 = vpop.eup %2502  ;;  %v825_v50 = vmul.f32 %v2501_v47, %v732_v28  ;;  %vm830_vm10 = vweird.f32 %v2501_v47  ;;  %v388_v27 = vpop.f32.mrf.mxu0 }
  0xba   :  { %v3066_v39 = vadd.f32 %v1904_v35, %v1903_v32  ;;  %v1803_v44 = vmul.f32 %v1542_v42, %v2945_v53  ;;  %2508 = vrcp.f32 %v3069_v46  ;;  %v3076_v53 = vadd.f32 1.0, %v2503_v49  ;;  %v2505_v57 = vpop.eup %2504  ;;  %vm831_vm13 = vmor %vm829_vm11, %vm830_vm10 }
  0xbb   :  { %v826_v54 = vsub.f32 1.0, %v825_v50  ;;  %v3089_v4 = vadd.f32 1.0, %v2505_v57  ;;  %vm1549_vm15 = vweird.f32 %v3069_v46  ;;  %v1553_v13 = vand.u32 2147483647, %v3069_v46 }
  0xbc   :  { %v1946_v36 = vsel %vm26_vm0, %v1803_v44, 0.0  ;;  %2510 = vrcp.f32 %v3076_v53  ;;  %v2507_v60 = vpop.eup %2506  ;;  %v1555_v14 = vand.u32 2147483648, %v3069_v46  ;;  %vm3104_vm4 = vcmp.eq.f32.partialorder %v1313_v43, 8.507059e+37 }
  0xbd   :  { %v3073_v48 = vadd.f32 %v1946_v36, %v1945_v41  ;;  %v827_v59 = vmul.f32 %v2501_v47, %v826_v54  ;;  %v1305_v2 = vmul.f32 %v2507_v60, %v764_v45  ;;  %vm1310_vm1 = vweird.f32 %v2507_v60  ;;  %v425_v45 = vpop.f32.mrf.mxu1 }
  0xbe   :  { %2512 = vrcp.f32 %v3089_v4  ;;  %vm3100_vm3 = vmor %vm1309_vm14, %vm1310_vm1  ;;  %v1316_v23 = vor.u32 1.1754944e-38, %v1315_v7  ;;  %v848_v40 = vand.u32 2147483647, %v3076_v53  ;;  %v850_v30 = vand.u32 2147483648, %v3076_v53 }
  0xbf   :  { %v828_v0 = vadd.f32 %v2501_v47, %v827_v59  ;;  %v1306_v10 = vsub.f32 1.0, %v1305_v2  ;;  %v1556_v34 = vor.u32 1.1754944e-38, %v1555_v14  ;;  %v2370_v25 = vmul.f32 -1.442695, %v3087_v63 }
  0xc0   :  { %v2509_v6 = vpop.eup %2508  ;;  %vm1554_vm6 = vcmp.eq.f32.partialorder %v1553_v13, 8.507059e+37  ;;  %v3124_v42 = vadd.f32 %v2919_v33, %v388_v27  ;;  %vm844_vm7 = vweird.f32 %v3076_v53  ;;  %vm3132_vm9 = vcmp.eq.f32.partialorder %v848_v40, 8.507059e+37 }
  0xc1   :  { %v832_v9 = vsel %vm831_vm13, %v2501_v47, %v828_v0  ;;  %v1545_v11 = vmul.f32 %v2509_v6, %v3069_v46  ;;  %vm1550_vm2 = vweird.f32 %v2509_v6  ;;  %v1307_v18 = vmul.f32 %v2507_v60, %v1306_v10  ;;  %v508_v0 = vpop.f32.mrf.mxu3 }
  0xc2   :  { %v837_v12 = vsel %vm3082_vm12, %v836_v1, %v832_v9  ;;  %v2511_v15 = vpop.eup %2510  ;;  %vm3116_vm5 = vmor %vm1549_vm15, %vm1550_vm2  ;;  %v851_v47 = vor.u32 1.1754944e-38, %v850_v30  ;;  %vm1324_vm10 = vweird.f32 %v3089_v4  ;;  %v1330_v59 = vand.u32 2147483648, %v3089_v4 }
  0xc3   :  { %v1756_v17 = vmul.f32 %v837_v12, %v2970_v16  ;;  %v1546_v19 = vsub.f32 1.0, %v1545_v11  ;;  %v840_v26 = vmul.f32 %v2511_v15, %v3076_v53  ;;  %v1308_v28 = vadd.f32 %v2507_v60, %v1307_v18  ;;  %v468_v53 = vpop.f32.mrf.mxu2 }
  0xc4   :  { %vm845_vm8 = vweird.f32 %v2511_v15  ;;  %v2513_v44 = vpop.eup %2512  ;;  %2514 = vpow2.f32 %v2370_v25  ;;  %v1331_v7 = vor.u32 1.1754944e-38, %v1330_v59  ;;  %v2323_v9 = vmul.f32 -1.442695, %v3124_v42 }
  0xc5   :  { %v1822_v16 = vsel %vm26_vm0, %v1756_v17, 0.0  ;;  %v1547_v29 = vmul.f32 %v2509_v6, %v1546_v19  ;;  %v841_v35 = vsub.f32 1.0, %v840_v26  ;;  %v1312_v37 = vsel %vm3100_vm3, %v2507_v60, %v1308_v28  ;;  %vm846_vm11 = vmor %vm844_vm7, %vm845_vm8  ;;  %v3179_v21 = vpop.f32.mrf.mxu1 }
  0xc6   :  { %v1823_v31 = vadd.f32 %v1822_v16, %v3028_v8  ;;  %v1317_v8 = vsel %vm3104_vm4, %v1316_v23, %v1312_v37  ;;  %v1320_v52 = vmul.f32 %v2513_v44, %v3089_v4  ;;  %vm1325_vm12 = vweird.f32 %v2513_v44 }
  0xc7   :  { %v1548_v38 = vadd.f32 %v2509_v6, %v1547_v29  ;;  %v842_v51 = vmul.f32 %v2511_v15, %v841_v35  ;;  %v1788_v46 = vmul.f32 %v1317_v8, %v3020_v3  ;;  %v1328_v3 = vand.u32 2147483647, %v3089_v4  ;;  %vm3157_vm13 = vmor %vm1324_vm10, %vm1325_vm12 }
  0xc8   :  { %v1321_v58 = vsub.f32 1.0, %v1320_v52  ;;  %v3163_v10 = vadd.f32 %v2919_v33, %v468_v53  ;;  %v3167_v12 = vadd.f32 %v2919_v33, %v508_v0  ;;  %2516 = vpow2.f32 %v2323_v9 }
  0xc9   :  { %v1552_v41 = vsel %vm3116_vm5, %v2509_v6, %v1548_v38  ;;  %v843_v50 = vadd.f32 %v2511_v15, %v842_v51  ;;  %v1906_v54 = vsel %vm26_vm0, %v1788_v46, 0.0  ;;  %vm1329_vm14 = vcmp.eq.f32.partialorder %v1328_v3, 8.507059e+37 }
  0xca   :  { %v1557_v49 = vsel %vm1554_vm6, %v1556_v34, %v1552_v41  ;;  %v1907_v56 = vadd.f32 %v1906_v54, %v3066_v39  ;;  %v1322_v6 = vmul.f32 %v2513_v44, %v1321_v58  ;;  %v3152_v39 = vadd.f32 %v2919_v33, %v425_v45  ;;  %v2515_v18 = vpop.eup %2514  ;;  %v510_v34 = vpop.f32.mrf.mxu3 }
  0xcb   :  { %v1804_v55 = vmul.f32 %v1557_v49, %v3023_v5  ;;  %v847_v57 = vsel %vm846_vm11, %v2511_v15, %v843_v50  ;;  %v2337_v5 = vmul.f32 -1.442695, %v3080_v61  ;;  %v2355_v14 = vmul.f32 -1.442695, %v3163_v10  ;;  %v470_v27 = vpop.f32.mrf.mxu2 }
  0xcc   :  { %v852_v62 = vsel %vm3132_vm9, %v851_v47, %v847_v57  ;;  %v1323_v11 = vadd.f32 %v2513_v44, %v1322_v6  ;;  %v2371_v15 = vmul.f32 -1.442695, %v3167_v12  ;;  %v2338_v19 = vmul.f32 -1.442695, %v3152_v39 }
  0xcd   :  { %v1948_v60 = vsel %vm26_vm0, %v1804_v55, 0.0  ;;  %v1757_v2 = vmul.f32 %v852_v62, %v3043_v20  ;;  %2518 = vpow2.f32 %v2337_v5  ;;  %v781_v26 = vadd.f32 1.0, %v2515_v18  ;;  %v3198_v45 = vpop.f32.mrf.mxu1 }
  0xce   :  { %v3148_v1 = vadd.f32 %v1948_v60, %v3073_v48  ;;  %v390_v48 = vpop.f32.mrf.mxu0  ;;  %v1327_v4 = vsel %vm3157_vm13, %v2513_v44, %v1323_v11  ;;  %2520 = vpow2.f32 %v2355_v14  ;;  %v2517_v28 = vpop.eup %2516  ;;  %v3201_v36 = vadd.f32 %v2919_v33, %v510_v34 }
  0xcf   :  { %v1824_v20 = vsel %vm26_vm0, %v1757_v2, 0.0  ;;  %v3176_v17 = vadd.f32 %v2919_v33, %v390_v48  ;;  %v1332_v22 = vsel %vm1329_vm14, %v1331_v7, %v1327_v4  ;;  %2522 = vpow2.f32 %v2371_v15 }
  0xd0   :  { %v3169_v13 = vadd.f32 %v1824_v20, %v1823_v31  ;;  %v1789_v23 = vmul.f32 %v1332_v22, %v3048_v24  ;;  %2524 = vrcp.f32 %v781_v26  ;;  %v3186_v30 = vadd.f32 1.0, %v2517_v28 }
  0xd1   :  { %v2324_v40 = vmul.f32 -1.442695, %v3176_v17  ;;  %2526 = vpow2.f32 %v2338_v19  ;;  %v3190_v24 = vadd.f32 %v2919_v33, %v470_v27  ;;  %v1568_v8 = vand.u32 2147483647, %v781_v26 }
  0xd2   :  { %v1908_v16 = vsel %vm26_vm0, %v1789_v23, 0.0  ;;  %v1570_v41 = vand.u32 2147483648, %v781_v26  ;;  %vm1564_vm15 = vweird.f32 %v781_v26  ;;  %v863_v52 = vand.u32 2147483647, %v3186_v30 }
  0xd3   :  { %v3184_v29 = vadd.f32 %v1908_v16, %v1907_v56  ;;  %v2519_v31 = vpop.eup %2518  ;;  %2528 = vpow2.f32 %v2324_v40  ;;  %v2356_v47 = vmul.f32 -1.442695, %v3190_v24  ;;  %v473_v55 = vpop.f32.mrf.mxu2  ;;  %vm3210_vm2 = vcmp.eq.f32.partialorder %v1568_v8, 8.507059e+37 }
  0xd4   :  { %v2521_v32 = vpop.eup %2520  ;;  %2530 = vrcp.f32 %v3186_v30  ;;  %v3194_v38 = vadd.f32 1.0, %v2519_v31  ;;  %v865_v57 = vand.u32 2147483648, %v3186_v30  ;;  %v1571_v59 = vor.u32 1.1754944e-38, %v1570_v41 }
  0xd5   :  { %v2523_v35 = vpop.eup %2522  ;;  %v3192_v25 = vadd.f32 1.0, %v2521_v32  ;;  %v2372_v62 = vmul.f32 -1.442695, %v3201_v36  ;;  %v3228_v6 = vadd.f32 %v2919_v33, %v473_v55  ;;  %vm859_vm4 = vweird.f32 %v3186_v30  ;;  %v3249_v28 = vpop.f32.mrf.mxu1 }
  0xd6   :  { %v2525_v37 = vpop.eup %2524  ;;  %v3196_v51 = vadd.f32 1.0, %v2523_v35  ;;  %v393_v54 = vpop.f32.mrf.mxu0  ;;  %vm3231_vm5 = vcmp.eq.f32.partialorder %v863_v52, 8.507059e+37  ;;  %v866_v20 = vor.u32 1.1754944e-38, %v865_v57 }
  0xd7   :  { %v2527_v44 = vpop.eup %2526  ;;  %v1560_v46 = vmul.f32 %v2525_v37, %v781_v26  ;;  %2532 = vrcp.f32 %v3192_v25  ;;  %vm1565_vm1 = vweird.f32 %v2525_v37  ;;  %v3225_v2 = vadd.f32 %v2919_v33, %v393_v54 }
  0xd8   :  { %2534 = vrcp.f32 %v3196_v51  ;;  %v3208_v53 = vadd.f32 1.0, %v2527_v44  ;;  %vm3218_vm3 = vmor %vm1564_vm15, %vm1565_vm1  ;;  %vm1339_vm6 = vweird.f32 %v3192_v25  ;;  %v1343_v11 = vand.u32 2147483647, %v3192_v25 }
  0xd9   :  { %v2529_v49 = vpop.eup %2528  ;;  %v1561_v50 = vsub.f32 1.0, %v1560_v46  ;;  %2536 = vrcp.f32 %v3194_v38  ;;  %v1345_v23 = vand.u32 2147483648, %v3192_v25  ;;  %v1585_v40 = vand.u32 2147483648, %v3196_v51 }
  0xda   :  { %v2531_v3 = vpop.eup %2530  ;;  %v3222_v5 = vadd.f32 1.0, %v2529_v49  ;;  %2538 = vpow2.f32 %v2356_v47  ;;  %vm1579_vm10 = vweird.f32 %v3196_v51  ;;  %v1583_v35 = vand.u32 2147483647, %v3196_v51 }
  0xdb   :  { %v1562_v58 = vmul.f32 %v2525_v37, %v1561_v50  ;;  %v855_v60 = vmul.f32 %v2531_v3, %v3186_v30  ;;  %vm860_vm7 = vweird.f32 %v2531_v3  ;;  %vm3256_vm12 = vcmp.eq.f32.partialorder %v1343_v11, 8.507059e+37 }
  0xdc   :  { %2540 = vrcp.f32 %v3222_v5  ;;  %vm861_vm9 = vmor %vm859_vm4, %vm860_vm7  ;;  %v1346_v49 = vor.u32 1.1754944e-38, %v1345_v23  ;;  %vm1584_vm15 = vcmp.eq.f32.partialorder %v1583_v35, 8.507059e+37  ;;  %v2325_v11 = vmul.f32 -1.442695, %v3225_v2 }
  0xdd   :  { %v1563_v43 = vadd.f32 %v2525_v37, %v1562_v58  ;;  %v856_v7 = vsub.f32 1.0, %v855_v60  ;;  %v2533_v48 = vpop.eup %2532  ;;  %2542 = vpow2.f32 %v2372_v62 }
  0xde   :  { %v2535_v4 = vpop.eup %2534  ;;  %v1335_v18 = vmul.f32 %v2533_v48, %v3192_v25  ;;  %vm1340_vm8 = vweird.f32 %v2533_v48 }
  0xdf   :  { %v1567_v14 = vsel %vm3218_vm3, %v2525_v37, %v1563_v43  ;;  %v857_v15 = vmul.f32 %v2531_v3, %v856_v7  ;;  %v3241_v19 = vpop.eup %2536  ;;  %v1575_v26 = vmul.f32 %v2535_v4, %v3196_v51  ;;  %vm1580_vm11 = vweird.f32 %v2535_v4  ;;  %vm3265_vm13 = vmor %vm1339_vm6, %vm1340_vm8 }
  0xe0   :  { %v1572_v22 = vsel %vm3210_vm2, %v1571_v59, %v1567_v14  ;;  %v1336_v31 = vsub.f32 1.0, %v1335_v18  ;;  %v2539_v32 = vpop.eup %2538  ;;  %vm3272_vm14 = vmor %vm1579_vm10, %vm1580_vm11  ;;  %v878_v51 = vand.u32 2147483647, %v3222_v5  ;;  %v880_v43 = vand.u32 2147483648, %v3222_v5 }
  0xe1   :  { %v1805_v27 = vmul.f32 %v1572_v22, %v3087_v63  ;;  %v858_v16 = vadd.f32 %v2531_v3, %v857_v15  ;;  %v1576_v34 = vsub.f32 1.0, %v1575_v26  ;;  %v3277_v25 = vadd.f32 1.0, %v2539_v32  ;;  %v513_v32 = vpop.f32.mrf.mxu3 }
  0xe2   :  { %v1337_v44 = vmul.f32 %v2533_v48, %v1336_v31  ;;  %v2541_v46 = vpop.eup %2540  ;;  %vm874_vm2 = vweird.f32 %v3222_v5  ;;  %v2357_v15 = vmul.f32 -1.442695, %v3228_v6  ;;  %v881_v22 = vor.u32 1.1754944e-38, %v880_v43 }
  0xe3   :  { %v1950_v37 = vsel %vm26_vm0, %v1805_v27, 0.0  ;;  %v862_v8 = vsel %vm861_vm9, %v2531_v3, %v858_v16  ;;  %v1577_v50 = vmul.f32 %v2535_v4, %v1576_v34  ;;  %v870_v3 = vmul.f32 %v2541_v46, %v3222_v5  ;;  %v2543_v18 = vpop.eup %2542 }
  0xe4   :  { %v1951_v41 = vadd.f32 %v1950_v37, %v3148_v1  ;;  %v867_v30 = vsel %vm3231_vm5, %v866_v20, %v862_v8  ;;  %v1338_v54 = vadd.f32 %v2533_v48, %v1337_v44  ;;  %v1586_v1 = vor.u32 1.1754944e-38, %v1585_v40  ;;  %v395_v8 = vpop.f32.mrf.mxu0 }
  0xe5   :  { %v1758_v52 = vmul.f32 %v867_v30, %v3124_v42  ;;  %v1578_v56 = vadd.f32 %v2535_v4, %v1577_v50  ;;  %v871_v58 = vsub.f32 1.0, %v870_v3  ;;  %vm875_vm1 = vweird.f32 %v2541_v46 }
  0xe6   :  { %v1342_v42 = vsel %vm3265_vm13, %v2533_v48, %v1338_v54  ;;  %v3292_v48 = vadd.f32 %v2919_v33, %v3179_v21  ;;  %vm876_vm3 = vmor %vm874_vm2, %vm875_vm1  ;;  %2544 = vrcp.f32 %v3277_v25  ;;  %vm879_vm4 = vcmp.eq.f32.partialorder %v878_v51, 8.507059e+37 }
  0xe7   :  { %v1826_v57 = vsel %vm26_vm0, %v1758_v52, 0.0  ;;  %v1347_v60 = vsel %vm3256_vm12, %v1346_v49, %v1342_v42  ;;  %v1582_v0 = vsel %vm3272_vm14, %v2535_v4, %v1578_v56  ;;  %v872_v9 = vmul.f32 %v2541_v46, %v871_v58 }
  0xe8   :  { %v1827_v59 = vadd.f32 %v1826_v57, %v3169_v13  ;;  %v1790_v62 = vmul.f32 %v1347_v60, %v3163_v10  ;;  %v1587_v7 = vsel %vm1584_vm15, %v1586_v1, %v1582_v0  ;;  %v3296_v13 = vadd.f32 %v2919_v33, %v3198_v45  ;;  %v3302_v10 = vpop.f32.mrf.mxu1 }
  0xe9   :  { %v1806_v20 = vmul.f32 %v1587_v7, %v3167_v12  ;;  %v873_v14 = vadd.f32 %v2541_v46, %v872_v9  ;;  %2546 = vrcp.f32 %v3208_v53  ;;  %v1065_v5 = vmul.f32 %v3241_v19, %v3194_v38 }
  0xea   :  { %5091 = vst [vmem:[#allocation6_spill] sm:$0xff] %v3296_v13  ;;  %v1910_v4 = vsel %vm26_vm0, %v1790_v62, 0.0  ;;  %v2339_v40 = vmul.f32 -1.442695, %v3292_v48  ;;  %v3317_v27 = vadd.f32 1.0, %v2543_v18  ;;  %2548 = vpow2.f32 %v2325_v11 }
  0xeb   :  { %v3306_v21 = vadd.f32 %v1910_v4, %v3184_v29  ;;  %v1952_v45 = vsel %vm26_vm0, %v1806_v20, 0.0  ;;  %v877_v23 = vsel %vm876_vm3, %v2541_v46, %v873_v14  ;;  %v2340_v16 = vmul.f32 -1.442695, %v3296_v13 }
  0xec   :  { %v3311_v12 = vadd.f32 %v1952_v45, %v1951_v41  ;;  %v882_v26 = vsel %vm879_vm4, %v881_v22, %v877_v23  ;;  %2550 = vpow2.f32 %v2357_v15  ;;  %v2545_v34 = vpop.eup %2544  ;;  %v1066_v35 = vsub.f32 1.0, %v1065_v5 }
  0xed   :  { %v1759_v29 = vmul.f32 %v882_v26, %v3176_v17  ;;  %2552 = vrcp.f32 %v3317_v27  ;;  %v1073_v17 = vand.u32 2147483647, %v3194_v38  ;;  %v1350_v63 = vmul.f32 %v2545_v34, %v3277_v25 }
  0xee   :  { %2554 = vpow2.f32 %v2339_v40  ;;  %v1358_v46 = vand.u32 2147483647, %v3277_v25  ;;  %v1075_v41 = vand.u32 2147483648, %v3194_v38  ;;  %v1360_v30 = vand.u32 2147483648, %v3277_v25 }
  0xef   :  { %v1828_v31 = vsel %vm26_vm0, %v1759_v29, 0.0  ;;  %v3324_v44 = vpop.eup %2546  ;;  %2556 = vpow2.f32 %v2340_v16  ;;  %v3332_v47 = vadd.f32 %v2919_v33, %v513_v32  ;;  %v1351_v50 = vsub.f32 1.0, %v1350_v63 }
  0xf0   :  { %v3322_v37 = vadd.f32 %v1828_v31, %v1827_v59  ;;  %v2549_v49 = vpop.eup %2548  ;;  %vm1354_vm5 = vweird.f32 %v3277_v25  ;;  %vm1355_vm6 = vweird.f32 %v2545_v34  ;;  %v438_v52 = vpop.f32.mrf.mxu1  ;;  %v3336_v54 = vadd.f32 %v2919_v33, %v395_v8 }
  0xf1   :  { %v1067_v1 = vmul.f32 %v3241_v19, %v1066_v35  ;;  %v3341_v3 = vmul.f32 %v3324_v44, %v3208_v53  ;;  %v3343_v56 = vadd.f32 1.0, %v2549_v49  ;;  %v3346_v57 = vadd.f32 %v2919_v33, %v438_v52  ;;  %vm3355_vm8 = vmor %vm1354_vm5, %vm1355_vm6 }
  0xf2   :  { %v2551_v55 = vpop.eup %2550  ;;  %v1352_v58 = vmul.f32 %v2545_v34, %v1351_v50  ;;  %vm3348_vm7 = vcmp.eq.f32.partialorder %v1358_v46, 8.507059e+37  ;;  %v2373_v59 = vmul.f32 -1.442695, %v3332_v47  ;;  %v1361_v0 = vor.u32 1.1754944e-38, %v1360_v30 }
  0xf3   :  { %v2553_v42 = vpop.eup %2552  ;;  %v3352_v51 = vadd.f32 1.0, %v2551_v55  ;;  %vm1594_vm9 = vweird.f32 %v3317_v27  ;;  %2558 = vrcp.f32 %v3343_v56  ;;  %v1600_v9 = vand.u32 2147483648, %v3317_v27 }
  0xf4   :  { %v1590_v43 = vmul.f32 %v2553_v42, %v3317_v27  ;;  %v2555_v62 = vpop.eup %2554  ;;  %v1353_v7 = vadd.f32 %v2545_v34, %v1352_v58  ;;  %v2326_v20 = vmul.f32 -1.442695, %v3336_v54  ;;  %vm1595_vm10 = vweird.f32 %v2553_v42 }
  0xf5   :  { %2560 = vrcp.f32 %v3352_v51  ;;  %v2557_v11 = vpop.eup %2556  ;;  %v1598_v14 = vand.u32 2147483647, %v3317_v27  ;;  %v2343_v15 = vmul.f32 -1.442695, %v3346_v57  ;;  %v3368_v18 = vadd.f32 %v3241_v19, %v1067_v1  ;;  %vm3385_vm11 = vmor %vm1594_vm9, %vm1595_vm10 }
  0xf6   :  { %v1591_v4 = vsub.f32 1.0, %v1590_v43  ;;  %v3372_v45 = vadd.f32 %v2919_v33, %v3249_v28  ;;  %v1357_v22 = vsel %vm3355_vm8, %v2545_v34, %v1353_v7  ;;  %2562 = vpow2.f32 %v2373_v59 }
  0xf7   :  { %v1081_v23 = vsub.f32 1.0, %v3341_v3  ;;  %v1088_v5 = vand.u32 2147483647, %v3208_v53  ;;  %v1362_v26 = vsel %vm3348_vm7, %v1361_v0, %v1357_v22  ;;  %v3380_v29 = vadd.f32 1.0, %v2555_v62 }
  0xf8   :  { %5096 = vst [vmem:[#allocation7_spill] sm:$0xff] %v3372_v45  ;;  %v1592_v40 = vmul.f32 %v2553_v42, %v1591_v4  ;;  %v1791_v16 = vmul.f32 %v1362_v26, %v3190_v24  ;;  %v1601_v28 = vor.u32 1.1754944e-38, %v1600_v9  ;;  %2564 = vpow2.f32 %v2326_v20  ;;  %v440_v43 = vpop.f32.mrf.mxu1 }
  0xf9   :  { %v2559_v31 = vpop.eup %2558  ;;  %v3389_v32 = vadd.f32 1.0, %v2557_v11  ;;  %vm1599_vm12 = vcmp.eq.f32.partialorder %v1598_v14, 8.507059e+37  ;;  %2566 = vpow2.f32 %v2343_v15  ;;  %v2341_v8 = vmul.f32 -1.442695, %v3372_v45 }
  0xfa   :  { %v1593_v34 = vadd.f32 %v2553_v42, %v1592_v40  ;;  %v1912_v63 = vsel %vm26_vm0, %v1791_v16, 0.0  ;;  %v885_v24 = vmul.f32 %v2559_v31, %v3343_v56  ;;  %v895_v27 = vand.u32 2147483648, %v3343_v56 }
  0xfb   :  { %v2561_v35 = vpop.eup %2560  ;;  %v3396_v46 = vadd.f32 %v1912_v63, %v3306_v21  ;;  %vm1369_vm13 = vweird.f32 %v3352_v51  ;;  %vm1069_vm14 = vweird.f32 %v3194_v38  ;;  %vm1070_vm15 = vweird.f32 %v3241_v19 }
  0xfc   :  { %v1597_v30 = vsel %vm3385_vm11, %v2553_v42, %v1593_v34  ;;  %v1365_v49 = vmul.f32 %v2561_v35, %v3352_v51  ;;  %v2563_v50 = vpop.eup %2562  ;;  %v886_v55 = vsub.f32 1.0, %v885_v24  ;;  %v1373_v1 = vand.u32 2147483647, %v3352_v51  ;;  %vm3462_vm10 = vmor %vm1069_vm14, %vm1070_vm15 }
  0xfd   :  { %v1602_v52 = vsel %vm1599_vm12, %v1601_v28, %v1597_v30  ;;  %v1375_v58 = vand.u32 2147483648, %v3352_v51  ;;  %vm1370_vm1 = vweird.f32 %v2561_v35  ;;  %v3407_v42 = vadd.f32 1.0, %v2563_v50 }
  0xfe   :  { %v1807_v21 = vmul.f32 %v1602_v52, %v3201_v36  ;;  %v1366_v25 = vsub.f32 1.0, %v1365_v49  ;;  %v2565_v59 = vpop.eup %2564  ;;  %2568 = vpow2.f32 %v2341_v8  ;;  %v887_v60 = vmul.f32 %v2559_v31, %v886_v55  ;;  %v3416_v36 = vld [vmem:[%s5044_s2] ss:$0 sm:$0xff]  ;;  %vm3428_vm5 = vmor %vm1369_vm13, %vm1370_vm1  ;;  %v475_v49 = vpop.f32.mrf.mxu2 }
  0xff   :  { %vm890_vm2 = vweird.f32 %v2559_v31  ;;  %v893_v0 = vand.u32 2147483647, %v3343_v56  ;;  %v2567_v62 = vpop.eup %2566  ;;  %vm1084_vm3 = vweird.f32 %v3208_v53  ;;  %2570 = vrcp.f32 %v3407_v42 }
 0x100   :  { %v1954_v7 = vsel %vm26_vm0, %v1807_v21, 0.0  ;;  %v1367_v9 = vmul.f32 %v2561_v35, %v1366_v25  ;;  %v3419_v20 = vadd.f32 %v3416_v36, %v440_v43  ;;  %v888_v4 = vadd.f32 %v2559_v31, %v887_v60 }
 0x101   :  { %v3422_v11 = vadd.f32 %v1954_v7, %v3311_v12  ;;  %vm889_vm4 = vweird.f32 %v3343_v56  ;;  %v1376_v15 = vor.u32 1.1754944e-38, %v1375_v58  ;;  %v896_v22 = vor.u32 1.1754944e-38, %v895_v27 }
 0x102   :  { %vm891_vm6 = vmor %vm889_vm4, %vm890_vm2  ;;  %v1368_v26 = vadd.f32 %v2561_v35, %v1367_v9  ;;  %vm1374_vm7 = vcmp.eq.f32.partialorder %v1373_v1, 8.507059e+37  ;;  %v3433_v40 = vadd.f32 1.0, %v2565_v59  ;;  %v3437_v12 = vadd.f32 %v3416_v36, %v3302_v10 }
 0x103   :  { %v892_v56 = vsel %vm891_vm6, %v2559_v31, %v888_v4  ;;  %vm894_vm8 = vcmp.eq.f32.partialorder %v893_v0, 8.507059e+37  ;;  %v3439_v16 = vadd.f32 1.0, %v2567_v62  ;;  %v1090_v51 = vand.u32 2147483648, %v3208_v53  ;;  %v515_v62 = vpop.f32.mrf.mxu3 }
 0x104   :  { %5101 = vst [vmem:[#allocation8_spill] sm:$0xff] %v3437_v12  ;;  %2572 = vrcp.f32 %v3380_v29  ;;  %v897_v33 = vsel %vm894_vm8, %v896_v22, %v892_v56  ;;  %v1372_v28 = vsel %vm3428_vm5, %v2561_v35, %v1368_v26  ;;  %v2569_v34 = vpop.eup %2568  ;;  %vm1085_vm9 = vweird.f32 %v3324_v44 }
 0x105   :  { %v1760_v8 = vmul.f32 %v897_v33, %v3225_v2  ;;  %v1377_v63 = vsel %vm1374_vm7, %v1376_v15, %v1372_v28  ;;  %2574 = vrcp.f32 %v3433_v40  ;;  %v2571_v10 = vpop.eup %2570  ;;  %v1082_v31 = vmul.f32 %v3324_v44, %v1081_v23  ;;  %vm3494_vm13 = vmor %vm1084_vm3, %vm1085_vm9 }
 0x106   :  { %2576 = vrcp.f32 %v3389_v32  ;;  %v1792_v24 = vmul.f32 %v1377_v63, %v3228_v6  ;;  %v2344_v27 = vmul.f32 -1.442695, %v3419_v20  ;;  %v2342_v35 = vmul.f32 -1.442695, %v3437_v12  ;;  %v443_v63 = vpop.f32.mrf.mxu1 }
 0x107   :  { %v1830_v30 = vsel %vm26_vm0, %v1760_v8, 0.0  ;;  %2578 = vrcp.f32 %v3439_v16  ;;  %v1605_v2 = vmul.f32 %v2571_v10, %v3407_v42  ;;  %vm1609_vm11 = vweird.f32 %v3407_v42 }
 0x108   :  { %v3467_v6 = vadd.f32 %v1830_v30, %v3322_v37  ;;  %v1914_v23 = vsel %vm26_vm0, %v1792_v24, 0.0  ;;  %v1615_v50 = vand.u32 2147483648, %v3407_v42  ;;  %vm1610_vm12 = vweird.f32 %v2571_v10 }
 0x109   :  { %v3473_v52 = vadd.f32 %v1914_v23, %v3396_v46  ;;  %v1606_v55 = vsub.f32 1.0, %v1605_v2  ;;  %v1613_v1 = vand.u32 2147483647, %v3407_v42  ;;  %v3479_v21 = vadd.f32 %v3324_v44, %v1082_v31  ;;  %vm3517_vm1 = vmor %vm1609_vm11, %vm1610_vm12 }
 0x10a   :  { %v3476_v58 = vpop.eup %2572  ;;  %2580 = vpow2.f32 %v2344_v27  ;;  %v3482_v37 = vadd.f32 %v3416_v36, %v475_v49  ;;  %v1072_v46 = vsel %vm3462_vm10, %v3241_v19, %v3368_v18  ;;  %v1076_v59 = vor.u32 1.1754944e-38, %v1075_v41 }
 0x10b   :  { %5104 = vst [vmem:[#allocation9_spill] sm:$0xff] %v3473_v52  ;;  %v2575_v25 = vpop.eup %2574  ;;  %v3498_v0 = vadd.f32 1.0, %v2569_v34  ;;  %v1607_v43 = vmul.f32 %v2571_v10, %v1606_v55  ;;  %vm3504_vm14 = vcmp.eq.f32.partialorder %v1073_v17, 8.507059e+37  ;;  %vm3510_vm15 = vcmp.eq.f32.partialorder %v1088_v5, 8.507059e+37  ;;  %v398_v17 = vpop.f32.mrf.mxu0 }
 0x10c   :  { %v3500_v7 = vpop.eup %2576  ;;  %v1091_v18 = vor.u32 1.1754944e-38, %v1090_v51  ;;  %v1616_v4 = vor.u32 1.1754944e-38, %v1615_v50  ;;  %v900_v38 = vmul.f32 %v2575_v25, %v3433_v40  ;;  %v1095_v53 = vmul.f32 %v3476_v58, %v3380_v29 }
 0x10d   :  { %v3522_v14 = vpop.eup %2578  ;;  %2582 = vpow2.f32 %v2342_v35  ;;  %v1608_v5 = vadd.f32 %v2571_v10, %v1607_v43  ;;  %vm1614_vm2 = vcmp.eq.f32.partialorder %v1613_v1, 8.507059e+37  ;;  %v1087_v42 = vsel %vm3494_vm13, %v3324_v44, %v3479_v21 }
 0x10e   :  { %v901_v15 = vsub.f32 1.0, %v900_v38  ;;  %v2358_v22 = vmul.f32 -1.442695, %v3482_v37  ;;  %v3532_v26 = vadd.f32 %v3416_v36, %v515_v62  ;;  %2584 = vrcp.f32 %v3498_v0  ;;  %v478_v38 = vpop.f32.mrf.mxu2 }
 0x10f   :  { %v1612_v56 = vsel %vm3517_vm1, %v2571_v10, %v1608_v5  ;;  %v910_v51 = vand.u32 2147483648, %v3433_v40  ;;  %v3539_v33 = vadd.f32 %v3416_v36, %v398_v17  ;;  %vm905_vm3 = vweird.f32 %v2575_v25 }
 0x110   :  { %v2581_v28 = vpop.eup %2580  ;;  %v1617_v34 = vsel %vm1614_vm2, %v1616_v4, %v1612_v56  ;;  %v902_v8 = vmul.f32 %v2575_v25, %v901_v15  ;;  %v908_v44 = vand.u32 2147483647, %v3433_v40  ;;  %v1096_v31 = vsub.f32 1.0, %v1095_v53 }
 0x111   :  { %v1155_v24 = vmul.f32 %v3522_v14, %v3439_v16  ;;  %v1808_v27 = vmul.f32 %v1617_v34, %v3332_v47  ;;  %v3546_v10 = vadd.f32 %v3416_v36, %v443_v63  ;;  %vm904_vm4 = vweird.f32 %v3433_v40 }
 0x112   :  { %v903_v35 = vadd.f32 %v2575_v25, %v902_v8  ;;  %2586 = vpow2.f32 %v2358_v22  ;;  %v2374_v30 = vmul.f32 -1.442695, %v3532_v26  ;;  %v1110_v49 = vmul.f32 %v3500_v7, %v3389_v32  ;;  %vm906_vm5 = vmor %vm904_vm4, %vm905_vm3 }
 0x113   :  { %v2583_v2 = vpop.eup %2582  ;;  %v1956_v3 = vsel %vm26_vm0, %v1808_v27, 0.0  ;;  %v911_v23 = vor.u32 1.1754944e-38, %v910_v51  ;;  %v3553_v50 = vadd.f32 1.0, %v2581_v28  ;;  %vm909_vm6 = vcmp.eq.f32.partialorder %v908_v44, 8.507059e+37 }
 0x114   :  { %v3556_v47 = vadd.f32 %v1956_v3, %v3422_v11  ;;  %v907_v55 = vsel %vm906_vm5, %v2575_v25, %v903_v35  ;;  %v2327_v40 = vmul.f32 -1.442695, %v3539_v33  ;;  %v3559_v1 = vpop.eup %2584  ;;  %v1156_v21 = vsub.f32 1.0, %v1155_v24 }
 0x115   :  { %v912_v60 = vsel %vm909_vm6, %v911_v23, %v907_v55  ;;  %v2345_v43 = vmul.f32 -1.442695, %v3546_v10  ;;  %v3562_v62 = vadd.f32 1.0, %v2583_v2  ;;  %2588 = vpow2.f32 %v2374_v30 }
 0x116   :  { %5113 = vst [vmem:[#allocation10_spill] sm:$0xff] %v3556_v47  ;;  %v1761_v9 = vmul.f32 %v912_v60, %v3336_v54  ;;  %v1077_v4 = vsel %vm3504_vm14, %v1076_v59, %v1072_v46  ;;  %v1092_v11 = vsel %vm3510_vm15, %v1091_v18, %v1087_v42  ;;  %v1097_v25 = vmul.f32 %v3476_v58, %v1096_v31 }
 0x117   :  { %2590 = vrcp.f32 %v3553_v50  ;;  %v1111_v53 = vsub.f32 1.0, %v1110_v49  ;;  %v1125_v5 = vmul.f32 %v3559_v1, %v3498_v0  ;;  %vm1099_vm7 = vweird.f32 %v3380_v29  ;;  %v518_v49 = vpop.f32.mrf.mxu3 }
 0x118   :  { %v2587_v17 = vpop.eup %2586  ;;  %v1832_v15 = vsel %vm26_vm0, %v1761_v9, 0.0  ;;  %2592 = vpow2.f32 %v2327_v40  ;;  %v1157_v54 = vmul.f32 %v3522_v14, %v1156_v21  ;;  %vm1100_vm8 = vweird.f32 %v3476_v58 }
 0x119   :  { %v3577_v46 = vadd.f32 %v1832_v15, %v3467_v6  ;;  %2594 = vpow2.f32 %v2345_v43  ;;  %v1103_v59 = vand.u32 2147483647, %v3380_v29  ;;  %v3583_v19 = vadd.f32 %v3416_v36, %v478_v38  ;;  %vm3600_vm11 = vmor %vm1099_vm7, %vm1100_vm8  ;;  %v400_v38 = vpop.f32.mrf.mxu0 }
 0x11a   :  { %2596 = vrcp.f32 %v3562_v62  ;;  %v1105_v41 = vand.u32 2147483648, %v3380_v29  ;;  %vm1159_vm9 = vweird.f32 %v3439_v16  ;;  %vm1160_vm10 = vweird.f32 %v3522_v14 }
 0x11b   :  { %v3588_v18 = vadd.f32 1.0, %v2587_v17  ;;  %v2589_v6 = vpop.eup %2588  ;;  %v1772_v42 = vmul.f32 %v1077_v4, %v3080_v61  ;;  %v1098_v22 = vadd.f32 %v3476_v58, %v1097_v25  ;;  %v1112_v56 = vmul.f32 %v3500_v7, %v1111_v53  ;;  %vm3617_vm15 = vmor %vm1159_vm9, %vm1160_vm10 }
 0x11c   :  { %v1126_v51 = vsub.f32 1.0, %v1125_v5  ;;  %v1773_v34 = vmul.f32 %v1092_v11, %v3152_v39  ;;  %v1158_v44 = vadd.f32 %v3522_v14, %v1157_v54  ;;  %v1163_v61 = vand.u32 2147483647, %v3439_v16 }
 0x11d   :  { %v3593_v28 = vpop.eup %2590  ;;  %v1165_v63 = vand.u32 2147483648, %v3439_v16  ;;  %vm3607_vm12 = vcmp.eq.f32.partialorder %v1103_v59, 8.507059e+37  ;;  %vm1114_vm13 = vweird.f32 %v3389_v32  ;;  %vm1115_vm14 = vweird.f32 %v3500_v7 }
 0x11e   :  { %v2593_v31 = vpop.eup %2592  ;;  %v2359_v29 = vmul.f32 -1.442695, %v3583_v19  ;;  %v1106_v35 = vor.u32 1.1754944e-38, %v1105_v41  ;;  %v1118_v30 = vand.u32 2147483647, %v3389_v32  ;;  %v1120_v2 = vand.u32 2147483648, %v3389_v32  ;;  %vm3636_vm1 = vmor %vm1114_vm13, %vm1115_vm14 }
 0x11f   :  { %v2595_v27 = vpop.eup %2594  ;;  %2598 = vrcp.f32 %v3588_v18  ;;  %v1102_v16 = vsel %vm3600_vm11, %v3476_v58, %v1098_v22  ;;  %v1113_v23 = vadd.f32 %v3500_v7, %v1112_v56  ;;  %v1127_v55 = vmul.f32 %v3559_v1, %v1126_v51 }
 0x120   :  { %v3625_v3 = vpop.eup %2596  ;;  %v3632_v40 = vadd.f32 1.0, %v2589_v6  ;;  %v1162_v60 = vsel %vm3617_vm15, %v3522_v14, %v1158_v44  ;;  %vm3643_vm2 = vcmp.eq.f32.partialorder %v1163_v61, 8.507059e+37  ;;  %v1166_v58 = vor.u32 1.1754944e-38, %v1165_v63  ;;  %v2455_v6 = vld [vmem:[%s5045_s3 + $0xc] sm:$0xf0] }
 0x121   :  { %v3647_v9 = vadd.f32 1.0, %v2593_v31  ;;  %v1170_v4 = vmul.f32 %v3593_v28, %v3553_v50  ;;  %v3651_v11 = vadd.f32 1.0, %v2595_v27  ;;  %2600 = vpow2.f32 %v2359_v29  ;;  %v445_v29 = vpop.f32.mrf.mxu1 }
 0x122   :  { %v3654_v32 = vadd.f32 %v3416_v36, %v518_v49  ;;  %vm3656_vm3 = vcmp.eq.f32.partialorder %v1118_v30, 8.507059e+37  ;;  %vm1129_vm4 = vweird.f32 %v3498_v0  ;;  %vm1130_vm5 = vweird.f32 %v3559_v1 }
 0x123   :  { %v1140_v14 = vmul.f32 %v3625_v3, %v3562_v62  ;;  %v1107_v17 = vsel %vm3607_vm12, %v1106_v35, %v1102_v16  ;;  %v1117_v53 = vsel %vm3636_vm1, %v3500_v7, %v1113_v23  ;;  %v1121_v5 = vor.u32 1.1754944e-38, %v1120_v2  ;;  %vm3679_vm6 = vmor %vm1129_vm4, %vm1130_vm5 }
 0x124   :  { %2602 = vrcp.f32 %v3632_v40  ;;  %v3673_v54 = vadd.f32 %v3559_v1, %v1127_v55  ;;  %v1135_v59 = vand.u32 2147483648, %v3498_v0  ;;  %v1167_v41 = vsel %vm3643_vm2, %v1166_v58, %v1162_v60  ;;  %v480_v60 = vpop.f32.mrf.mxu2 }
 0x125   :  { %v3670_v15 = vpop.eup %2598  ;;  %2604 = vrcp.f32 %v3647_v9  ;;  %v1171_v7 = vsub.f32 1.0, %v1170_v4  ;;  %v2375_v22 = vmul.f32 -1.442695, %v3654_v32  ;;  %v3686_v56 = vadd.f32 %v3416_v36, %v400_v38 }
 0x126   :  { %2606 = vrcp.f32 %v3651_v11  ;;  %v3689_v51 = vsel %vm26_vm0, %v1772_v42, 0.0  ;;  %v1141_v8 = vsub.f32 1.0, %v1140_v14  ;;  %v1150_v44 = vand.u32 2147483648, %v3562_v62 }
 0x127   :  { %5128 = vst [vmem:[#allocation11_spill] sm:$0xff] %v3689_v51  ;;  %v2601_v61 = vpop.eup %2600  ;;  %v3693_v63 = vsel %vm26_vm0, %v1773_v34, 0.0  ;;  %v3696_v31 = vmul.f32 %v1107_v17, %v3292_v48  ;;  %v3700_v24 = vsel %vm3656_vm3, %v1121_v5, %v1117_v53  ;;  %v1380_v39 = vmul.f32 %v3670_v15, %v3588_v18 }
 0x128   :  { %5129 = vst [vmem:[#allocation12_spill] sm:$0xff] %v3693_v63  ;;  %v3709_v34 = vor.u32 1.1754944e-38, %v1135_v59  ;;  %v1778_v48 = vmul.f32 %v1167_v41, %v3346_v57  ;;  %v1172_v2 = vmul.f32 %v3593_v28, %v1171_v7  ;;  %2608 = vpow2.f32 %v2375_v22 }
 0x129   :  { %5130 = vst [vmem:[#allocation13_spill] sm:$0xff] %v3696_v31  ;;  %v2328_v49 = vmul.f32 -1.442695, %v3686_v56  ;;  %v3720_v23 = vmul.f32 %v3625_v3, %v1141_v8  ;;  %v3722_v55 = vor.u32 1.1754944e-38, %v1150_v44  ;;  %v3724_v21 = vadd.f32 1.0, %v2601_v61 }
 0x12a   :  { %5131 = vst [vmem:[#allocation14_spill] sm:$0xff] %v3700_v24  ;;  %v3712_v35 = vpop.eup %2602  ;;  %v3727_v57 = vadd.f32 %v3416_v36, %v445_v29  ;;  %vm1174_vm7 = vweird.f32 %v3553_v50  ;;  %vm1175_vm8 = vweird.f32 %v3593_v28  ;;  %v1178_v58 = vand.u32 2147483647, %v3553_v50 }
 0x12b   :  { %5132 = vst [vmem:[#allocation15_spill] sm:$0xff] %v3709_v34  ;;  %v3717_v16 = vpop.eup %2604  ;;  %v1381_v4 = vsub.f32 1.0, %v1380_v39  ;;  %v3735_v25 = vsel %vm26_vm0, %v1778_v48, 0.0  ;;  %v1180_v14 = vand.u32 2147483648, %v3553_v50  ;;  %v1388_v38 = vand.u32 2147483647, %v3588_v18  ;;  %vm3747_vm9 = vmor %vm1174_vm7, %vm1175_vm8 }
 0x12c   :  { %5133 = vst [vmem:[#allocation16_spill] sm:$0xff] %v3722_v55  ;;  %v3729_v43 = vpop.eup %2606  ;;  %v1620_v17 = vmul.f32 %v3712_v35, %v3632_v40  ;;  %v1173_v53 = vadd.f32 %v3593_v28, %v1172_v2  ;;  %v915_v5 = vmul.f32 %v3717_v16, %v3647_v9  ;;  %2610 = vpow2.f32 %v2328_v49 }
 0x12d   :  { %v3745_v59 = vadd.f32 %v3416_v36, %v480_v60  ;;  %v1390_v50 = vand.u32 2147483648, %v3588_v18  ;;  %v1185_v7 = vmul.f32 %v3729_v43, %v3651_v11  ;;  %2612 = vrcp.f32 %v3724_v21 }
 0x12e   :  { %v2346_v22 = vmul.f32 -1.442695, %v3727_v57  ;;  %v2609_v8 = vpop.eup %2608  ;;  %v1834_v44 = vrot.slane %v3577_v46, 4  ;;  %v1382_v61 = vmul.f32 %v3670_v15, %v1381_v4  ;;  %vm1384_vm10 = vweird.f32 %v3588_v18 }
 0x12f   :  { %v1630_v39 = vand.u32 2147483648, %v3632_v40  ;;  %vm3760_vm11 = vcmp.eq.f32.partialorder %v1178_v58, 8.507059e+37  ;;  %v1181_v48 = vor.u32 1.1754944e-38, %v1180_v14  ;;  %v1621_v2 = vsub.f32 1.0, %v1620_v17  ;;  %v520_v14 = vpop.f32.mrf.mxu3 }
 0x130   :  { %v1628_v49 = vand.u32 2147483647, %v3632_v40  ;;  %v1177_v60 = vsel %vm3747_vm9, %v3593_v28, %v1173_v53  ;;  %vm1385_vm12 = vweird.f32 %v3670_v15  ;;  %vm3769_vm13 = vcmp.eq.f32.partialorder %v1388_v38, 8.507059e+37  ;;  %v403_v53 = vpop.f32.mrf.mxu0 }
 0x131   :  { %v916_v42 = vsub.f32 1.0, %v915_v5  ;;  %v2360_v58 = vmul.f32 -1.442695, %v3745_v59  ;;  %v1391_v30 = vor.u32 1.1754944e-38, %v1390_v50  ;;  %v1186_v27 = vsub.f32 1.0, %v1185_v7  ;;  %vm3789_vm15 = vmor %vm1384_vm10, %vm1385_vm12 }
 0x132   :  { %v3774_v12 = vadd.f32 1.0, %v2609_v8  ;;  %2614 = vpow2.f32 %v2346_v22  ;;  %v2611_v17 = vpop.eup %2610  ;;  %v1835_v45 = vadd.f32 %v1834_v44, %v3577_v46  ;;  %v1383_v28 = vadd.f32 %v3670_v15, %v1382_v61 }
 0x133   :  { %vm1624_vm14 = vweird.f32 %v3632_v40  ;;  %v3779_v38 = vor.u32 1.1754944e-38, %v1630_v39  ;;  %v3781_v41 = vpop.eup %2612  ;;  %v1182_v5 = vsel %vm3760_vm11, %v1181_v48, %v1177_v60  ;;  %v1622_v46 = vmul.f32 %v3712_v35, %v1621_v2  ;;  %v448_v48 = vpop.f32.mrf.mxu1 }
 0x134   :  { %vm919_vm1 = vweird.f32 %v3647_v9  ;;  %v923_v7 = vand.u32 2147483647, %v3647_v9  ;;  %v925_v22 = vand.u32 2147483648, %v3647_v9  ;;  %vm1625_vm2 = vweird.f32 %v3712_v35 }
 0x135   :  { %vm3798_vm3 = vcmp.eq.f32.partialorder %v1628_v49, 8.507059e+37  ;;  %v917_v18 = vmul.f32 %v3717_v16, %v916_v42  ;;  %2616 = vpow2.f32 %v2360_v58  ;;  %v3804_v44 = vadd.f32 %v3416_v36, %v520_v14  ;;  %vm3831_vm9 = vmor %vm1624_vm14, %vm1625_vm2 }
 0x136   :  { %v1187_v61 = vmul.f32 %v3729_v43, %v1186_v27  ;;  %2618 = vrcp.f32 %v3774_v12  ;;  %v3808_v39 = vadd.f32 1.0, %v2611_v17  ;;  %v3811_v29 = vadd.f32 %v3416_v36, %v403_v53 }
 0x137   :  { %v1836_v2 = vrot.slane %v1835_v45, 2  ;;  %v1779_v49 = vmul.f32 %v1182_v5, %v3419_v20  ;;  %v1387_v42 = vsel %vm3789_vm15, %v3670_v15, %v1383_v28  ;;  %v1395_v60 = vmul.f32 %v3781_v41, %v3724_v21  ;;  %v483_v20 = vpop.f32.mrf.mxu2  ;;  %v523_v4 = vpop.f32.mrf.mxu3 }
 0x138   :  { %v2615_v58 = vpop.eup %2614  ;;  %v1623_v27 = vadd.f32 %v3712_v35, %v1622_v46  ;;  %vm920_vm4 = vweird.f32 %v3717_v16  ;;  %vm3821_vm5 = vcmp.eq.f32.partialorder %v923_v7, 8.507059e+37  ;;  %vm1189_vm7 = vweird.f32 %v3651_v11 }
 0x139   :  { %vm1190_vm8 = vweird.f32 %v3729_v43  ;;  %v1193_v17 = vand.u32 2147483647, %v3651_v11  ;;  %v1195_v28 = vand.u32 2147483648, %v3651_v11  ;;  %v2376_v53 = vmul.f32 -1.442695, %v3804_v44  ;;  %vm3866_vm11 = vmor %vm919_vm1, %vm920_vm4 }
 0x13a   :  { %v3839_v5 = vadd.f32 %v3416_v36, %v448_v48  ;;  %v918_v50 = vadd.f32 %v3717_v16, %v917_v18  ;;  %v1188_v46 = vadd.f32 %v3729_v43, %v1187_v61  ;;  %2620 = vrcp.f32 %v3808_v39  ;;  %vm3845_vm10 = vmor %vm1189_vm7, %vm1190_vm8 }
 0x13b   :  { %v2329_v40 = vmul.f32 -1.442695, %v3811_v29  ;;  %v2617_v7 = vpop.eup %2616  ;;  %v926_v31 = vor.u32 1.1754944e-38, %v925_v22  ;;  %v1396_v11 = vsub.f32 1.0, %v1395_v60  ;;  %v3849_v47 = vadd.f32 1.0, %v2615_v58 }
 0x13c   :  { %v3852_v48 = vadd.f32 %v3416_v36, %v483_v20  ;;  %v3854_v55 = vpop.eup %2618  ;;  %v1837_v18 = vadd.f32 %v1836_v2, %v1835_v45  ;;  %v1883_v61 = vsel %vm26_vm0, %v1779_v49, 0.0  ;;  %v1392_v24 = vsel %vm3769_vm13, %v1391_v30, %v1387_v42 }
 0x13d   :  { %v1627_v22 = vsel %vm3831_vm9, %v3712_v35, %v1623_v27  ;;  %vm3870_vm12 = vcmp.eq.f32.partialorder %v1193_v17, 8.507059e+37  ;;  %v1196_v45 = vor.u32 1.1754944e-38, %v1195_v28  ;;  %2622 = vpow2.f32 %v2376_v53 }
 0x13e   :  { %v2347_v30 = vmul.f32 -1.442695, %v3839_v5  ;;  %v922_v35 = vsel %vm3866_vm11, %v3717_v16, %v918_v50  ;;  %v1192_v9 = vsel %vm3845_vm10, %v3729_v43, %v1188_v46  ;;  %v3881_v2 = vadd.f32 1.0, %v2617_v7 }
 0x13f   :  { %2624 = vpow2.f32 %v2329_v40  ;;  %v1397_v49 = vmul.f32 %v3781_v41, %v1396_v11  ;;  %v1635_v42 = vmul.f32 %v3854_v55, %v3774_v12  ;;  %v2361_v27 = vmul.f32 -1.442695, %v3852_v48 }
 0x140   :  { %2626 = vrcp.f32 %v3849_v47  ;;  %v3888_v20 = vpop.eup %2620  ;;  %v1838_v15 = vrot.slane %v1837_v18, 1  ;;  %v1793_v16 = vmul.f32 %v1392_v24, %v3482_v37  ;;  %v1632_v63 = vsel %vm3798_vm3, %v3779_v38, %v1627_v22 }
 0x141   :  { %v3895_v43 = vadd.f32 %v3416_v36, %v523_v4  ;;  %v927_v17 = vsel %vm3821_vm5, %v926_v31, %v922_v35  ;;  %vm1399_vm13 = vweird.f32 %v3724_v21  ;;  %vm1400_vm14 = vweird.f32 %v3781_v41 }
 0x142   :  { %2628 = vpow2.f32 %v2347_v30  ;;  %v1197_v28 = vsel %vm3870_vm12, %v1196_v45, %v1192_v9  ;;  %v1403_v37 = vand.u32 2147483647, %v3724_v21  ;;  %v1405_v24 = vand.u32 2147483648, %v3724_v21  ;;  %vm3919_vm15 = vmor %vm1399_vm13, %vm1400_vm14  ;;  %v405_v30 = vpop.f32.mrf.mxu0 }
 0x143   :  { %2630 = vrcp.f32 %v3881_v2  ;;  %v2623_v38 = vpop.eup %2622  ;;  %v1398_v8 = vadd.f32 %v3781_v41, %v1397_v49  ;;  %v1636_v53 = vsub.f32 1.0, %v1635_v42  ;;  %v930_v31 = vmul.f32 %v3888_v20, %v3808_v39 }
 0x144   :  { %2632 = vpow2.f32 %v2361_v27  ;;  %v3911_v50 = vadd.f32 %v3625_v3, %v3720_v23  ;;  %v1884_v46 = vadd.f32 %v1883_v61, %v3735_v25  ;;  %v1762_v40 = vmul.f32 %v927_v17, %v3539_v33 }
 0x145   :  { %v2625_v14 = vpop.eup %2624  ;;  %v2377_v11 = vmul.f32 -1.442695, %v3895_v43  ;;  %v3926_v60 = vadd.f32 %v1838_v15, %v1837_v18  ;;  %v3929_v23 = vsel %vm26_vm0, %v1793_v16, 0.0  ;;  %v3932_v25 = vmul.f32 %v1632_v63, %v3532_v26 }
 0x146   :  { %v3924_v22 = vpop.eup %2626  ;;  %5156 = vst [vmem:[#allocation17_spill] sm:$0xff] %v3929_v23  ;;  %v1643_v33 = vand.u32 2147483647, %v3774_v12  ;;  %v1780_v21 = vmul.f32 %v1197_v28, %v3546_v10  ;;  %vm3936_vm1 = vcmp.eq.f32.partialorder %v1403_v37, 8.507059e+37  ;;  %v1406_v58 = vor.u32 1.1754944e-38, %v1405_v24 }
 0x147   :  { %v3940_v45 = vadd.f32 1.0, %v2623_v38  ;;  %v1402_v4 = vsel %vm3919_vm15, %v3781_v41, %v1398_v8  ;;  %v1637_v26 = vmul.f32 %v3854_v55, %v1636_v53  ;;  %v931_v35 = vsub.f32 1.0, %v930_v31 }
 0x148   :  { %v2629_v18 = vpop.eup %2628  ;;  %v3946_v9 = vadd.f32 1.0, %v2625_v14  ;;  %v3951_v10 = vsel %vm26_vm0, %v1762_v40, 0.0  ;;  %vm1639_vm2 = vweird.f32 %v3774_v12  ;;  %v1200_v42 = vmul.f32 %v3924_v22, %v3849_v47 }
 0x149   :  { %v3948_v49 = vpop.eup %2630  ;;  %2634 = vpow2.f32 %v2377_v11  ;;  %vm1640_vm3 = vweird.f32 %v3854_v55  ;;  %vm3957_vm4 = vcmp.eq.f32.partialorder %v1643_v33, 8.507059e+37  ;;  %v1645_v15 = vand.u32 2147483648, %v3774_v12 }
 0x14a   :  { %v2633_v27 = vpop.eup %2632  ;;  %v3963_v16 = vadd.f32 %v3416_v36, %v405_v30  ;;  %v1885_v63 = vsel %vm26_vm0, %v1780_v21, 0.0  ;;  %v1407_v17 = vsel %vm3936_vm1, %v1406_v58, %v1402_v4  ;;  %v938_v28 = vand.u32 2147483647, %v3808_v39  ;;  %vm3977_vm5 = vmor %vm1639_vm2, %vm1640_vm3 }
 0x14b   :  { %2636 = vrcp.f32 %v3940_v45  ;;  %v1638_v37 = vadd.f32 %v3854_v55, %v1637_v26  ;;  %v932_v24 = vmul.f32 %v3888_v20, %v931_v35  ;;  %v3973_v38 = vadd.f32 1.0, %v2629_v18 }
 0x14c   :  { %2638 = vrcp.f32 %v3946_v9  ;;  %v940_v53 = vand.u32 2147483648, %v3808_v39  ;;  %v1201_v31 = vsub.f32 1.0, %v1200_v42  ;;  %v1410_v14 = vmul.f32 %v3948_v49, %v3881_v2 }
 0x14d   :  { %v3984_v40 = vadd.f32 1.0, %v2633_v27  ;;  %v1794_v7 = vmul.f32 %v1407_v17, %v3583_v19  ;;  %v1646_v11 = vor.u32 1.1754944e-38, %v1645_v15  ;;  %vm934_vm7 = vweird.f32 %v3808_v39  ;;  %v450_v15 = vpop.f32.mrf.mxu1 }
 0x14e   :  { %v2330_v33 = vmul.f32 -1.442695, %v3963_v16  ;;  %v3989_v21 = vadd.f32 %v1885_v63, %v1884_v46  ;;  %vm935_vm8 = vweird.f32 %v3888_v20  ;;  %vm3992_vm9 = vcmp.eq.f32.partialorder %v938_v28, 8.507059e+37 }
 0x14f   :  { %v2635_v12 = vpop.eup %2634  ;;  %v1208_v58 = vand.u32 2147483647, %v3849_v47  ;;  %v1642_v19 = vsel %vm3977_vm5, %v3854_v55, %v1638_v37  ;;  %v933_v30 = vadd.f32 %v3888_v20, %v932_v24  ;;  %v1210_v18 = vand.u32 2147483648, %v3849_v47  ;;  %vm4021_vm11 = vmor %vm934_vm7, %vm935_vm8 }
 0x150   :  { %2640 = vrcp.f32 %v3973_v38  ;;  %v941_v4 = vor.u32 1.1754944e-38, %v940_v53  ;;  %v1202_v26 = vmul.f32 %v3924_v22, %v1201_v31  ;;  %v1411_v35 = vsub.f32 1.0, %v1410_v14 }
 0x151   :  { %v4003_v46 = vpop.eup %2636  ;;  %2642 = vrcp.f32 %v3984_v40  ;;  %v4010_v27 = vsel %vm26_vm0, %v1794_v7, 0.0  ;;  %vm1204_vm10 = vweird.f32 %v3849_v47  ;;  %v4013_v55 = vadd.f32 1.0, %v2635_v12 }
 0x152   :  { %v4007_v42 = vpop.eup %2638  ;;  %2644 = vpow2.f32 %v2330_v33  ;;  %v1647_v63 = vsel %vm3957_vm4, %v1646_v11, %v1642_v19  ;;  %vm1205_vm12 = vweird.f32 %v3924_v22  ;;  %v1418_v28 = vand.u32 2147483647, %v3881_v2  ;;  %v485_v11 = vpop.f32.mrf.mxu2 }
 0x153   :  { %v1420_v37 = vand.u32 2147483648, %v3881_v2  ;;  %v937_v24 = vsel %vm4021_vm11, %v3888_v20, %v933_v30  ;;  %vm4031_vm13 = vcmp.eq.f32.partialorder %v1208_v58, 8.507059e+37  ;;  %v1211_v8 = vor.u32 1.1754944e-38, %v1210_v18  ;;  %vm4051_vm14 = vmor %vm1204_vm10, %vm1205_vm12 }
 0x154   :  { %v1650_v39 = vmul.f32 %v4003_v46, %v3940_v45  ;;  %v1203_v53 = vadd.f32 %v3924_v22, %v1202_v26  ;;  %v1412_v31 = vmul.f32 %v3948_v49, %v1411_v35  ;;  %v945_v14 = vmul.f32 %v4007_v42, %v3946_v9 }
 0x155   :  { %v4042_v7 = vadd.f32 %v3416_v36, %v450_v15  ;;  %v4047_v33 = vmul.f32 %v1647_v63, %v3654_v32  ;;  %vm1414_vm15 = vweird.f32 %v3881_v2  ;;  %v1660_v58 = vand.u32 2147483648, %v3940_v45 }
 0x156   :  { %v4044_v20 = vpop.eup %2640  ;;  %2646 = vrcp.f32 %v4013_v55  ;;  %v942_v30 = vsel %vm3992_vm9, %v941_v4, %v937_v24  ;;  %vm1415_vm1 = vweird.f32 %v3948_v49  ;;  %vm4063_vm2 = vcmp.eq.f32.partialorder %v1418_v28, 8.507059e+37 }
 0x157   :  { %v4058_v19 = vpop.eup %2642  ;;  %v1421_v47 = vor.u32 1.1754944e-38, %v1420_v37  ;;  %v1651_v26 = vsub.f32 1.0, %v1650_v39  ;;  %vm1654_vm3 = vweird.f32 %v3940_v45  ;;  %v1658_v35 = vand.u32 2147483647, %v3940_v45  ;;  %vm4082_vm4 = vmor %vm1414_vm15, %vm1415_vm1 }
 0x158   :  { %v2645_v18 = vpop.eup %2644  ;;  %v2348_v15 = vmul.f32 -1.442695, %v4042_v7  ;;  %v1207_v61 = vsel %vm4051_vm14, %v3924_v22, %v1203_v53  ;;  %v1413_v4 = vadd.f32 %v3948_v49, %v1412_v31  ;;  %v946_v63 = vsub.f32 1.0, %v945_v14  ;;  %v408_v53 = vpop.f32.mrf.mxu0 }
 0x159   :  { %v4075_v17 = vadd.f32 %v3416_v36, %v485_v11  ;;  %v4078_v28 = vmul.f32 %v942_v30, %v3686_v56  ;;  %v4086_v24 = vor.u32 1.1754944e-38, %v1660_v58  ;;  %v1215_v22 = vmul.f32 %v4044_v20, %v3973_v38  ;;  %v525_v11 = vpop.f32.mrf.mxu3 }
 0x15a   :  { %v4090_v39 = vadd.f32 1.0, %v2645_v18  ;;  %vm949_vm5 = vweird.f32 %v3946_v9  ;;  %v953_v31 = vand.u32 2147483647, %v3946_v9  ;;  %v955_v56 = vand.u32 2147483648, %v3946_v9  ;;  %v488_v37 = vpop.f32.mrf.mxu2 }
 0x15b   :  { %v1223_v2 = vand.u32 2147483647, %v3973_v38  ;;  %v1425_v14 = vmul.f32 %v4058_v19, %v3984_v40  ;;  %v1212_v58 = vsel %vm4031_vm13, %v1211_v8, %v1207_v61  ;;  %v1652_v30 = vmul.f32 %v4003_v46, %v1651_v26  ;;  %v453_v26 = vpop.f32.mrf.mxu1 }
 0x15c   :  { %v4098_v12 = vpop.eup %2646  ;;  %vm1219_vm7 = vweird.f32 %v3973_v38  ;;  %v1225_v18 = vand.u32 2147483648, %v3973_v38  ;;  %2648 = vpow2.f32 %v2348_v15  ;;  %v1417_v13 = vsel %vm4082_vm4, %v3948_v49, %v1413_v4 }
 0x15d   :  { %vm4108_vm8 = vcmp.eq.f32.partialorder %v1658_v35, 8.507059e+37  ;;  %v947_v23 = vmul.f32 %v4007_v42, %v946_v63  ;;  %v2362_v41 = vmul.f32 -1.442695, %v4075_v17  ;;  %v4115_v8 = vadd.f32 %v3416_v36, %v408_v53 }
 0x15e   :  { %vm1655_vm9 = vweird.f32 %v4003_v46  ;;  %v1216_v61 = vsub.f32 1.0, %v1215_v22  ;;  %2650 = vrcp.f32 %v4090_v39  ;;  %v4120_v15 = vadd.f32 %v3416_v36, %v525_v11 }
 0x15f   :  { %v4123_v49 = vmul.f32 %v1212_v58, %v3727_v57  ;;  %v956_v35 = vor.u32 1.1754944e-38, %v955_v56  ;;  %v1426_v4 = vsub.f32 1.0, %v1425_v14  ;;  %v1665_v63 = vmul.f32 %v4098_v12, %v4013_v55  ;;  %vm4137_vm10 = vmor %vm1654_vm3, %vm1655_vm9 }
 0x160   :  { %v1422_v53 = vsel %vm4063_vm2, %v1421_v47, %v1417_v13  ;;  %v1653_v52 = vadd.f32 %v4003_v46, %v1652_v30  ;;  %v4130_v22 = vor.u32 1.1754944e-38, %v1225_v18  ;;  %v4133_v34 = vadd.f32 %v3416_v36, %v453_v26 }
 0x161   :  { %v948_v56 = vadd.f32 %v4007_v42, %v947_v23  ;;  %vm950_vm11 = vweird.f32 %v4007_v42  ;;  %vm4143_vm12 = vcmp.eq.f32.partialorder %v953_v31, 8.507059e+37  ;;  %2652 = vpow2.f32 %v2362_v41 }
 0x162   :  { %v2331_v13 = vmul.f32 -1.442695, %v4115_v8  ;;  %v2649_v47 = vpop.eup %2648  ;;  %v1217_v14 = vmul.f32 %v4044_v20, %v1216_v61  ;;  %vm1429_vm13 = vweird.f32 %v3984_v40  ;;  %v2378_v45 = vmul.f32 -1.442695, %v4120_v15  ;;  %vm4170_vm15 = vmor %vm949_vm5, %vm950_vm11  ;;  %v2457_v61 = vld [vmem:[%s5045_s3 + $0x24] sm:$0xf] }
 0x163   :  { %v4152_v11 = vadd.f32 %v3416_v36, %v488_v37  ;;  %v1795_v23 = vmul.f32 %v1422_v53, %v3745_v59  ;;  %vm4155_vm14 = vcmp.eq.f32.partialorder %v1223_v2, 8.507059e+37  ;;  %v1427_v58 = vmul.f32 %v4058_v19, %v1426_v4  ;;  %v2409_v37 = vld [vmem:[%s5045_s3 + $0x28] sm:$0xf] }
 0x164   :  { %v1433_v30 = vand.u32 2147483647, %v3984_v40  ;;  %v1666_v18 = vsub.f32 1.0, %v1665_v63  ;;  %v4161_v41 = vpop.eup %2650  ;;  %v1657_v26 = vsel %vm4137_vm10, %v4003_v46, %v1653_v52  ;;  %vm1220_vm1 = vweird.f32 %v4044_v20  ;;  %v2403_v46 = vld [vmem:[%s5045_s3 + $0x30] sm:$0xf0] }
 0x165   :  { %v1435_v59 = vand.u32 2147483648, %v3984_v40  ;;  %v2349_v2 = vmul.f32 -1.442695, %v4133_v34  ;;  %v952_v52 = vsel %vm4170_vm15, %v4007_v42, %v948_v56  ;;  %vm1430_vm2 = vweird.f32 %v4058_v19  ;;  %v2460_v42 = vld [vmem:[%s5045_s3 + $0x34] sm:$0xf0]  ;;  %vm4201_vm3 = vmor %vm1219_vm7, %vm1220_vm1  ;;  %v528_v40 = vpop.f32.mrf.mxu3 }
 0x166   :  { %v4184_v9 = vadd.f32 1.0, %v2649_v47  ;;  %2654 = vpow2.f32 %v2331_v13  ;;  %v1218_v4 = vadd.f32 %v4044_v20, %v1217_v14  ;;  %v2406_v63 = vor.u32 %v2457_v61, %v2403_v46  ;;  %vm4216_vm4 = vmor %vm1429_vm13, %vm1430_vm2 }
 0x167   :  { %2656 = vpow2.f32 %v2378_v45  ;;  %v2363_v53 = vmul.f32 -1.442695, %v4152_v11  ;;  %v2653_v57 = vpop.eup %2652  ;;  %v1428_v13 = vadd.f32 %v4058_v19, %v1427_v58  ;;  %v1667_v47 = vmul.f32 %v4098_v12, %v1666_v18 }
 0x168   :  { %v960_v14 = vmul.f32 %v4161_v41, %v4090_v39  ;;  %v2410_v45 = vor.u32 %v2460_v42, %v2409_v37  ;;  %v1662_v36 = vsel %vm4108_vm8, %v4086_v24, %v1657_v26  ;;  %vm4220_vm5 = vcmp.eq.f32.partialorder %v1433_v30, 8.507059e+37  ;;  %2098 = vmatpush.bf16.msrb.mxu2 %v2406_v63 }
 0x169   :  { %v1436_v18 = vor.u32 1.1754944e-38, %v1435_v59  ;;  %2658 = vpow2.f32 %v2349_v2  ;;  %vm1669_vm7 = vweird.f32 %v4013_v55  ;;  %vm1670_vm9 = vweird.f32 %v4098_v12 }
 0x16a   :  { %v1675_v51 = vand.u32 2147483648, %v4013_v55  ;;  %2660 = vrcp.f32 %v4184_v9  ;;  %2111 = vmatpush.bf16.msrb.mxu3 %v2410_v45  ;;  %v957_v24 = vsel %vm4143_vm12, %v956_v35, %v952_v52  ;;  %v1673_v30 = vand.u32 2147483647, %v4013_v55  ;;  %vm4250_vm8 = vmor %vm1669_vm7, %vm1670_vm9 }
 0x16b   :  { %v4231_v26 = vadd.f32 1.0, %v2653_v57  ;;  %2662 = vpow2.f32 %v2363_v53  ;;  %v1222_v2 = vsel %vm4201_vm3, %v4044_v20, %v1218_v4  ;;  %v1432_v61 = vsel %vm4216_vm4, %v4058_v19, %v1428_v13  ;;  %v4257_v19 = vld [vmem:[%s5044_s2] ss:$0 sm:$0xff] }
 0x16c   :  { %v2655_v59 = vpop.eup %2654  ;;  %v1668_v46 = vadd.f32 %v4098_v12, %v1667_v47  ;;  %v961_v63 = vsub.f32 1.0, %v960_v14  ;;  %v1966_v35 = vsel %vm26_vm0, %v4047_v33, 0.0  ;;  %v1841_v32 = vsel %vm26_vm0, %v4078_v28, 0.0 }
 0x16d   :  { %v2657_v37 = vpop.eup %2656  ;;  %v1887_v52 = vsel %vm26_vm0, %v4123_v49, 0.0  ;;  %v4260_v33 = vadd.f32 %v4257_v19, %v528_v40  ;;  %v1925_v28 = vsel %vm26_vm0, %v1795_v23, 0.0  ;;  %v1811_v49 = vmul.f32 %v1662_v36, %v3804_v44 }
 0x16e   :  { %v1764_v4 = vmul.f32 %v957_v24, %v3811_v29  ;;  %v1676_v42 = vor.u32 1.1754944e-38, %v1675_v51  ;;  %v1227_v53 = vsel %vm4155_vm14, %v4130_v22, %v1222_v2  ;;  %v1437_v57 = vsel %vm4220_vm5, %v1436_v18, %v1432_v61 }
 0x16f   :  { %v2659_v55 = vpop.eup %2658  ;;  %2664 = vrcp.f32 %v4231_v26  ;;  %v4271_v56 = vadd.f32 1.0, %v2655_v59  ;;  %v1672_v44 = vsel %vm4250_vm8, %v4098_v12, %v1668_v46  ;;  %vm1674_vm10 = vcmp.eq.f32.partialorder %v1673_v30, 8.507059e+37  ;;  %v410_v30 = vpop.f32.mrf.mxu0 }
 0x170   :  { %v4273_v13 = vpop.eup %2660  ;;  %v962_v29 = vmul.f32 %v4161_v41, %v961_v63  ;;  %v4279_v23 = vadd.f32 1.0, %v2657_v37  ;;  %v1842_v22 = vadd.f32 %v1841_v32, %v3951_v10  ;;  %v1888_v47 = vadd.f32 %v1887_v52, %v3989_v21  ;;  %v530_v63 = vpop.f32.mrf.mxu3 }
 0x171   :  { %v2663_v31 = vpop.eup %2662  ;;  %v1926_v14 = vadd.f32 %v1925_v28, %v4010_v27  ;;  %v2379_v45 = vmul.f32 -1.442695, %v4260_v33  ;;  %v1967_v36 = vsel %vm26_vm0, %v1811_v49, 0.0  ;;  %v1843_v38 = vsel %vm26_vm0, %v1764_v4, 0.0 }
 0x172   :  { %v1782_v12 = vmul.f32 %v1227_v53, %v3839_v5  ;;  %v1796_v58 = vmul.f32 %v1437_v57, %v3852_v48  ;;  %v1677_v18 = vsel %vm1674_vm10, %v1676_v42, %v1672_v44  ;;  %v1230_v51 = vmul.f32 %v4273_v13, %v4184_v9  ;;  %v455_v42 = vpop.f32.mrf.mxu1 }
 0x173   :  { %2666 = vrcp.f32 %v4271_v56  ;;  %v4292_v10 = vadd.f32 1.0, %v2659_v55  ;;  %v963_v21 = vadd.f32 %v4161_v41, %v962_v29  ;;  %vm965_vm11 = vweird.f32 %v4161_v41 }
 0x174   :  { %2668 = vrcp.f32 %v4279_v23  ;;  %v4297_v27 = vadd.f32 1.0, %v2663_v31  ;;  %v4301_v5 = vadd.f32 %v1967_v36, %v1966_v35  ;;  %v4303_v48 = vadd.f32 %v1843_v38, %v1842_v22 }
 0x175   :  { %v4299_v40 = vpop.eup %2664  ;;  %v970_v24 = vand.u32 2147483648, %v4090_v39  ;;  %2670 = vpow2.f32 %v2379_v45  ;;  %v1889_v59 = vsel %vm26_vm0, %v1782_v12, 0.0  ;;  %v1812_v2 = vmul.f32 %v1677_v18, %v3895_v43 }
 0x176   :  { %vm964_vm12 = vweird.f32 %v4090_v39  ;;  %v968_v61 = vand.u32 2147483647, %v4090_v39  ;;  %v1927_v46 = vsel %vm26_vm0, %v1796_v58, 0.0  ;;  %v1231_v37 = vsub.f32 1.0, %v1230_v51 }
 0x177   :  { %vm4311_vm13 = vmor %vm964_vm12, %vm965_vm11  ;;  %v1238_v35 = vand.u32 2147483647, %v4184_v9  ;;  %2672 = vrcp.f32 %v4292_v10  ;;  %v1440_v43 = vmul.f32 %v4299_v40, %v4231_v26  ;;  %v4324_v39 = vadd.f32 %v4257_v19, %v410_v30 }
 0x178   :  { %v967_v32 = vsel %vm4311_vm13, %v4161_v41, %v963_v21  ;;  %2674 = vrcp.f32 %v4297_v27  ;;  %v4328_v20 = vadd.f32 %v1889_v59, %v1888_v47  ;;  %v971_v28 = vor.u32 1.1754944e-38, %v970_v24  ;;  %v490_v21 = vpop.f32.mrf.mxu2 }
 0x179   :  { %v4326_v52 = vpop.eup %2666  ;;  %v1240_v49 = vand.u32 2147483648, %v4184_v9  ;;  %v1450_v4 = vand.u32 2147483648, %v4231_v26  ;;  %v4334_v41 = vadd.f32 %v1927_v46, %v1926_v14  ;;  %v4337_v53 = vsel %vm26_vm0, %v1812_v2, 0.0 }
 0x17a   :  { %v4332_v55 = vpop.eup %2668  ;;  %vm969_vm14 = vcmp.eq.f32.partialorder %v968_v61, 8.507059e+37  ;;  %vm1234_vm15 = vweird.f32 %v4184_v9  ;;  %v1232_v29 = vmul.f32 %v4273_v13, %v1231_v37  ;;  %vm1444_vm1 = vweird.f32 %v4231_v26  ;;  %v413_v37 = vpop.f32.mrf.mxu0 }
 0x17b   :  { %v2671_v57 = vpop.eup %2670  ;;  %v972_v44 = vsel %vm969_vm14, %v971_v28, %v967_v32  ;;  %v1448_v31 = vand.u32 2147483647, %v4231_v26  ;;  %vm4343_vm2 = vcmp.eq.f32.partialorder %v1238_v35, 8.507059e+37  ;;  %v1441_v47 = vsub.f32 1.0, %v1440_v43  ;;  %v2401_v32 = vld [vmem:[%s5045_s3 + $0x20] sm:$0xf] }
 0x17c   :  { %v975_v14 = vmul.f32 %v4326_v52, %v4271_v56  ;;  %v2332_v45 = vmul.f32 -1.442695, %v4324_v39  ;;  %v4351_v36 = vadd.f32 %v4257_v19, %v455_v42  ;;  %v1241_v12 = vor.u32 1.1754944e-38, %v1240_v49 }
 0x17d   :  { %v4353_v38 = vpop.eup %2672  ;;  %v4355_v58 = vor.u32 1.1754944e-38, %v1450_v4  ;;  %v1680_v18 = vmul.f32 %v4332_v55, %v4279_v23  ;;  %v1688_v51 = vand.u32 2147483647, %v4279_v23  ;;  %vm1235_vm3 = vweird.f32 %v4273_v13 }
 0x17e   :  { %v4360_v24 = vpop.eup %2674  ;;  %v1690_v30 = vand.u32 2147483648, %v4279_v23  ;;  %v983_v59 = vand.u32 2147483647, %v4271_v56  ;;  %v4365_v2 = vadd.f32 1.0, %v2671_v57  ;;  %v1765_v61 = vmul.f32 %v972_v44, %v3963_v16  ;;  %vm4383_vm7 = vmor %vm1234_vm15, %vm1235_vm3 }
 0x17f   :  { %v1233_v46 = vadd.f32 %v4273_v13, %v1232_v29  ;;  %vm1445_vm4 = vweird.f32 %v4299_v40  ;;  %2676 = vpow2.f32 %v2332_v45  ;;  %v1442_v35 = vmul.f32 %v4299_v40, %v1441_v47 }
 0x180   :  { %vm4371_vm5 = vcmp.eq.f32.partialorder %v1448_v31, 8.507059e+37  ;;  %v976_v43 = vsub.f32 1.0, %v975_v14  ;;  %v2350_v28 = vmul.f32 -1.442695, %v4351_v36  ;;  %v4377_v49 = vadd.f32 %v4257_v19, %v490_v21  ;;  %vm4416_vm10 = vmor %vm1444_vm1, %vm1445_vm4 }
 0x181   :  { %v1681_v4 = vsub.f32 1.0, %v1680_v18  ;;  %v985_v42 = vand.u32 2147483648, %v4271_v56  ;;  %v1245_v57 = vmul.f32 %v4353_v38, %v4292_v10  ;;  %v1455_v44 = vmul.f32 %v4360_v24, %v4297_v27 }
 0x182   :  { %2678 = vrcp.f32 %v4365_v2  ;;  %v2364_v29 = vmul.f32 -1.442695, %v4377_v49  ;;  %v4395_v31 = vadd.f32 %v4257_v19, %v530_v63  ;;  %v4398_v9 = vadd.f32 %v4257_v19, %v413_v37 }
 0x183   :  { %v4401_v47 = vsel %vm26_vm0, %v1765_v61, 0.0  ;;  %vm1684_vm9 = vweird.f32 %v4279_v23  ;;  %v4404_v14 = vor.u32 1.1754944e-38, %v1690_v30  ;;  %vm979_vm8 = vweird.f32 %v4271_v56 }
 0x184   :  { %v1237_v45 = vsel %vm4383_vm7, %v4273_v13, %v1233_v46  ;;  %v1443_v18 = vadd.f32 %v4299_v40, %v1442_v35  ;;  %v977_v21 = vmul.f32 %v4326_v52, %v976_v43  ;;  %2680 = vpow2.f32 %v2350_v28 }
 0x185   :  { %v2677_v63 = vpop.eup %2676  ;;  %v1682_v30 = vmul.f32 %v4332_v55, %v1681_v4  ;;  %vm4421_vm11 = vcmp.eq.f32.partialorder %v1688_v51, 8.507059e+37  ;;  %v986_v13 = vor.u32 1.1754944e-38, %v985_v42  ;;  %v1246_v46 = vsub.f32 1.0, %v1245_v57  ;;  %v493_v4 = vpop.f32.mrf.mxu2 }
 0x186   :  { %v2333_v35 = vmul.f32 -1.442695, %v4398_v9  ;;  %vm4426_vm12 = vcmp.eq.f32.partialorder %v983_v59, 8.507059e+37  ;;  %v1456_v28 = vsub.f32 1.0, %v1455_v44  ;;  %v4430_v26 = vadd.f32 1.0, %v2677_v63 }
 0x187   :  { %2682 = vpow2.f32 %v2364_v29  ;;  %v2380_v16 = vmul.f32 -1.442695, %v4395_v31  ;;  %v1242_v51 = vsel %vm4343_vm2, %v1241_v12, %v1237_v45  ;;  %vm1685_vm13 = vweird.f32 %v4332_v55 }
 0x188   :  { %vm980_vm14 = vweird.f32 %v4326_v52  ;;  %2684 = vpow2.f32 %v2333_v35  ;;  %v4437_v42 = vpop.eup %2678  ;;  %v1447_v59 = vsel %vm4416_vm10, %v4299_v40, %v1443_v18  ;;  %v978_v57 = vadd.f32 %v4326_v52, %v977_v21  ;;  %vm4454_vm1 = vmor %vm1684_vm9, %vm1685_vm13 }
 0x189   :  { %vm1249_vm15 = vweird.f32 %v4292_v10  ;;  %v1253_v44 = vand.u32 2147483647, %v4292_v10  ;;  %v1683_v22 = vadd.f32 %v4332_v55, %v1682_v30  ;;  %v1247_v12 = vmul.f32 %v4353_v38, %v1246_v46  ;;  %vm4469_vm2 = vmor %vm979_vm8, %vm980_vm14 }
 0x18a   :  { %v1255_v29 = vand.u32 2147483648, %v4292_v10  ;;  %2686 = vrcp.f32 %v4430_v26  ;;  %v2681_v45 = vpop.eup %2680  ;;  %v1783_v63 = vmul.f32 %v1242_v51, %v4042_v7  ;;  %v1457_v18 = vmul.f32 %v4360_v24, %v1456_v28 }
 0x18b   :  { %2688 = vpow2.f32 %v2380_v16  ;;  %v4460_v21 = vadd.f32 %v4257_v19, %v493_v4  ;;  %v1452_v61 = vsel %vm4371_vm5, %v4355_v58, %v1447_v59  ;;  %vm1250_vm3 = vweird.f32 %v4353_v38  ;;  %v2459_v58 = vld [vmem:[%s5045_s3 + $0x2c] sm:$0xf0] }
 0x18c   :  { %vm1459_vm4 = vweird.f32 %v4297_v27  ;;  %v1695_v23 = vmul.f32 %v4437_v42, %v4365_v2  ;;  %v982_v30 = vsel %vm4469_vm2, %v4326_v52, %v978_v57  ;;  %vm1460_vm5 = vweird.f32 %v4360_v24  ;;  %vm4499_vm7 = vmor %vm1249_vm15, %vm1250_vm3 }
 0x18d   :  { %v2683_v56 = vpop.eup %2682  ;;  %v1463_v46 = vand.u32 2147483647, %v4297_v27  ;;  %v2402_v35 = vor.u32 %v2459_v58, %v2401_v32  ;;  %v1687_v16 = vsel %vm4454_vm1, %v4332_v55, %v1683_v22  ;;  %v1248_v51 = vadd.f32 %v4353_v38, %v1247_v12  ;;  %v533_v12 = vpop.f32.mrf.mxu3  ;;  %vm4518_vm8 = vmor %vm1459_vm4, %vm1460_vm5 }
 0x18e   :  { %v2685_v28 = vpop.eup %2684  ;;  %v1465_v4 = vand.u32 2147483648, %v4297_v27  ;;  %v4493_v59 = vadd.f32 1.0, %v2681_v45  ;;  %vm4503_vm9 = vcmp.eq.f32.partialorder %v1253_v44, 8.507059e+37  ;;  %v1256_v40 = vor.u32 1.1754944e-38, %v1255_v29 }
 0x18f   :  { %v1458_v55 = vadd.f32 %v4360_v24, %v1457_v18  ;;  %2085 = vmatpush.bf16.msrb.mxu1 %v2402_v35  ;;  %v2365_v22 = vmul.f32 -1.442695, %v4460_v21  ;;  %v1797_v7 = vmul.f32 %v1452_v61, %v4075_v17  ;;  %v987_v10 = vsel %vm4426_vm12, %v986_v13, %v982_v30 }
 0x190   :  { %v4509_v45 = vpop.eup %2686  ;;  %v1696_v29 = vsub.f32 1.0, %v1695_v23  ;;  %v4522_v18 = vadd.f32 1.0, %v2685_v28  ;;  %v1891_v58 = vsel %vm26_vm0, %v1783_v63, 0.0  ;;  %v1692_v17 = vsel %vm4421_vm11, %v4404_v14, %v1687_v16  ;;  %v415_v63 = vpop.f32.mrf.mxu0 }
 0x191   :  { %v2689_v32 = vpop.eup %2688  ;;  %vm4528_vm10 = vcmp.eq.f32.partialorder %v1463_v46, 8.507059e+37  ;;  %v4532_v43 = vadd.f32 1.0, %v2683_v56  ;;  %v1252_v27 = vsel %vm4499_vm7, %v4353_v38, %v1248_v51  ;;  %v1466_v61 = vor.u32 1.1754944e-38, %v1465_v4 }
 0x192   :  { %2690 = vrcp.f32 %v4493_v59  ;;  %v4539_v23 = vadd.f32 %v4257_v19, %v533_v12  ;;  %v1766_v37 = vmul.f32 %v987_v10, %v4115_v8  ;;  %v1462_v14 = vsel %vm4518_vm8, %v4360_v24, %v1458_v55 }
 0x193   :  { %v990_v56 = vmul.f32 %v4509_v45, %v4430_v26  ;;  %2692 = vpow2.f32 %v2365_v22  ;;  %v1929_v30 = vsel %vm26_vm0, %v1797_v7, 0.0  ;;  %v1697_v38 = vmul.f32 %v4437_v42, %v1696_v29 }
 0x194   :  { %v4549_v46 = vadd.f32 1.0, %v2689_v32  ;;  %2694 = vrcp.f32 %v4522_v18  ;;  %v1813_v35 = vmul.f32 %v1692_v17, %v4120_v15  ;;  %v1257_v8 = vsel %vm4503_vm9, %v1256_v40, %v1252_v27 }
 0x195   :  { %2696 = vrcp.f32 %v4532_v43  ;;  %v4557_v24 = vadd.f32 %v4257_v19, %v415_v63  ;;  %v1467_v28 = vsel %vm4528_vm10, %v1466_v61, %v1462_v14  ;;  %vm1699_vm11 = vweird.f32 %v4365_v2 }
 0x196   :  { %vm1700_vm12 = vweird.f32 %v4437_v42  ;;  %v2381_v16 = vmul.f32 -1.442695, %v4539_v23  ;;  %v1847_v51 = vsel %vm26_vm0, %v1766_v37, 0.0  ;;  %v1703_v15 = vand.u32 2147483647, %v4365_v2 }
 0x197   :  { %v1705_v4 = vand.u32 2147483648, %v4365_v2  ;;  %v991_v52 = vsub.f32 1.0, %v990_v56  ;;  %v1846_v40 = vadd.f32 %v4401_v47, %v4303_v48  ;;  %v1784_v55 = vmul.f32 %v1257_v8, %v4133_v34  ;;  %vm4586_vm13 = vmor %vm1699_vm11, %vm1700_vm12  ;;  %v535_v56 = vpop.f32.mrf.mxu3 }
 0x198   :  { %v4567_v57 = vpop.eup %2690  ;;  %v1698_v22 = vadd.f32 %v4437_v42, %v1697_v38  ;;  %2698 = vrcp.f32 %v4549_v46  ;;  %v4576_v7 = vadd.f32 %v4337_v53, %v4301_v5  ;;  %v4579_v10 = vadd.f32 %v1891_v58, %v4328_v20 }
 0x199   :  { %v2693_v12 = vpop.eup %2692  ;;  %v1798_v44 = vmul.f32 %v1467_v28, %v4152_v11  ;;  %v2334_v48 = vmul.f32 -1.442695, %v4557_v24  ;;  %v4594_v5 = vadd.f32 %v1929_v30, %v4334_v41  ;;  %v4597_v20 = vsel %vm26_vm0, %v1813_v35, 0.0  ;;  %v495_v41 = vpop.f32.mrf.mxu2 }
 0x19a   :  { %v4591_v47 = vpop.eup %2694  ;;  %v4599_v53 = vadd.f32 %v1847_v51, %v1846_v40  ;;  %2700 = vpow2.f32 %v2381_v16  ;;  %vm4603_vm14 = vcmp.eq.f32.partialorder %v1703_v15, 8.507059e+37  ;;  %v1706_v29 = vor.u32 1.1754944e-38, %v1705_v4  ;;  %v418_v51 = vpop.f32.mrf.mxu0 }
 0x19b   :  { %v4601_v11 = vpop.eup %2696  ;;  %v992_v32 = vmul.f32 %v4509_v45, %v991_v52  ;;  %v1260_v58 = vmul.f32 %v4567_v57, %v4493_v59  ;;  %v4611_v17 = vsel %vm26_vm0, %v1784_v55, 0.0  ;;  %v1702_v13 = vsel %vm4586_vm13, %v4437_v42, %v1698_v22 }
 0x19c   :  { %v998_v27 = vand.u32 2147483647, %v4430_v26  ;;  %v1005_v61 = vmul.f32 %v4591_v47, %v4522_v18  ;;  %v4620_v63 = vsel %vm26_vm0, %v1798_v44, 0.0  ;;  %v1000_v37 = vand.u32 2147483648, %v4430_v26 }
 0x19d   :  { %v4623_v14 = vadd.f32 1.0, %v2693_v12  ;;  %2702 = vpow2.f32 %v2334_v48  ;;  %vm994_vm15 = vweird.f32 %v4430_v26  ;;  %v1270_v42 = vand.u32 2147483648, %v4493_v59 }
 0x19e   :  { %v4625_v30 = vpop.eup %2698  ;;  %v1470_v38 = vmul.f32 %v4601_v11, %v4532_v43  ;;  %v4632_v35 = vadd.f32 %v4257_v19, %v495_v41  ;;  %v1707_v8 = vsel %vm4603_vm14, %v1706_v29, %v1702_v13  ;;  %v993_v28 = vadd.f32 %v4509_v45, %v992_v32 }
 0x19f   :  { %vm995_vm1 = vweird.f32 %v4509_v45  ;;  %v1261_v16 = vsub.f32 1.0, %v1260_v58  ;;  %vm4638_vm2 = vcmp.eq.f32.partialorder %v998_v27, 8.507059e+37  ;;  %v1268_v52 = vand.u32 2147483647, %v4493_v59 }
 0x1a0   :  { %v2701_v15 = vpop.eup %2700  ;;  %v1006_v40 = vsub.f32 1.0, %v1005_v61  ;;  %v4644_v55 = vadd.f32 %v4257_v19, %v535_v56  ;;  %v1001_v22 = vor.u32 1.1754944e-38, %v1000_v37  ;;  %vm1264_vm3 = vweird.f32 %v4493_v59  ;;  %vm4655_vm4 = vmor %vm994_vm15, %vm995_vm1 }
 0x1a1   :  { %v1710_v12 = vmul.f32 %v4625_v30, %v4549_v46  ;;  %2704 = vrcp.f32 %v4623_v14  ;;  %v4651_v44 = vmul.f32 %v1707_v8, %v4260_v33  ;;  %v1271_v48 = vor.u32 1.1754944e-38, %v1270_v42 }
 0x1a2   :  { %v1471_v2 = vsub.f32 1.0, %v1470_v38  ;;  %vm1474_vm5 = vweird.f32 %v4532_v43  ;;  %v997_v32 = vsel %vm4655_vm4, %v4509_v45, %v993_v28  ;;  %v1262_v58 = vmul.f32 %v4567_v57, %v1261_v16  ;;  %v420_v59 = vpop.f32.mrf.mxu0 }
 0x1a3   :  { %v2703_v29 = vpop.eup %2702  ;;  %v1478_v33 = vand.u32 2147483647, %v4532_v43  ;;  %v4665_v41 = vadd.f32 1.0, %v2701_v15  ;;  %vm4667_vm7 = vcmp.eq.f32.partialorder %v1268_v52, 8.507059e+37  ;;  %v1480_v13 = vand.u32 2147483648, %v4532_v43 }
 0x1a4   :  { %vm1714_vm9 = vweird.f32 %v4549_v46  ;;  %v1718_v27 = vand.u32 2147483647, %v4549_v46  ;;  %v1007_v61 = vmul.f32 %v4591_v47, %v1006_v40  ;;  %vm1265_vm8 = vweird.f32 %v4567_v57 }
 0x1a5   :  { %v1711_v45 = vsub.f32 1.0, %v1710_v12  ;;  %v1720_v37 = vand.u32 2147483648, %v4549_v46  ;;  %v1013_v56 = vand.u32 2147483647, %v4522_v18  ;;  %v1002_v42 = vsel %vm4638_vm2, %v1001_v22, %v997_v32  ;;  %vm4692_vm11 = vmor %vm1264_vm3, %vm1265_vm8 }
 0x1a6   :  { %v1472_v38 = vmul.f32 %v4601_v11, %v1471_v2  ;;  %v1015_v8 = vand.u32 2147483648, %v4522_v18  ;;  %v4682_v28 = vadd.f32 1.0, %v2703_v29  ;;  %v1263_v15 = vadd.f32 %v4567_v57, %v1262_v58 }
 0x1a7   :  { %v4684_v16 = vpop.eup %2704  ;;  %vm1475_vm10 = vweird.f32 %v4601_v11  ;;  %2706 = vrcp.f32 %v4665_v41  ;;  %v2366_v52 = vmul.f32 -1.442695, %v4632_v35  ;;  %vm4696_vm12 = vcmp.eq.f32.partialorder %v1478_v33, 8.507059e+37 }
 0x1a8   :  { %v1008_v22 = vadd.f32 %v4591_v47, %v1007_v61  ;;  %vm1010_vm13 = vweird.f32 %v4591_v47  ;;  %2708 = vrcp.f32 %v4682_v28  ;;  %v1767_v12 = vmul.f32 %v1002_v42, %v4324_v39  ;;  %vm4709_vm15 = vmor %vm1474_vm5, %vm1475_vm10 }
 0x1a9   :  { %v1481_v34 = vor.u32 1.1754944e-38, %v1480_v13  ;;  %v1712_v2 = vmul.f32 %v4625_v30, %v1711_v45  ;;  %vm1009_vm14 = vweird.f32 %v4522_v18  ;;  %v1473_v29 = vadd.f32 %v4601_v11, %v1472_v38 }
 0x1aa   :  { %v1721_v58 = vor.u32 1.1754944e-38, %v1720_v37  ;;  %v1485_v33 = vmul.f32 %v4684_v16, %v4623_v14  ;;  %2710 = vpow2.f32 %v2366_v52  ;;  %v1267_v39 = vsel %vm4692_vm11, %v4567_v57, %v1263_v15  ;;  %vm4725_vm3 = vmor %vm1009_vm14, %vm1010_vm13 }
 0x1ab   :  { %vm1715_vm1 = vweird.f32 %v4625_v30  ;;  %vm4719_vm2 = vcmp.eq.f32.partialorder %v1718_v27, 8.507059e+37  ;;  %vm4729_vm4 = vcmp.eq.f32.partialorder %v1013_v56, 8.507059e+37  ;;  %v1016_v61 = vor.u32 1.1754944e-38, %v1015_v8 }
 0x1ac   :  { %v1012_v57 = vsel %vm4725_vm3, %v4591_v47, %v1008_v22  ;;  %v2382_v27 = vmul.f32 -1.442695, %v4644_v55  ;;  %v4738_v45 = vadd.f32 %v4257_v19, %v418_v51  ;;  %v4741_v37 = vadd.f32 %v4257_v19, %v420_v59  ;;  %vm4759_vm8 = vmor %vm1714_vm9, %vm1715_vm1 }
 0x1ad   :  { %v4743_v42 = vpop.eup %2706  ;;  %v1849_v56 = vsel %vm26_vm0, %v1767_v12, 0.0  ;;  %v1713_v38 = vadd.f32 %v4625_v30, %v1712_v2  ;;  %vm1489_vm5 = vweird.f32 %v4623_v14  ;;  %v1493_v8 = vand.u32 2147483647, %v4623_v14 }
 0x1ae   :  { %v2709_v15 = vpop.eup %2708  ;;  %v1477_v47 = vsel %vm4709_vm15, %v4601_v11, %v1473_v29  ;;  %v1486_v51 = vsub.f32 1.0, %v1485_v33  ;;  %2712 = vpow2.f32 %v2382_v27  ;;  %v2335_v19 = vmul.f32 -1.442695, %v4738_v45 }
 0x1af   :  { %v1272_v52 = vsel %vm4667_vm7, %v1271_v48, %v1267_v39  ;;  %v1017_v22 = vsel %vm4729_vm4, %v1016_v61, %v1012_v57  ;;  %v1020_v11 = vmul.f32 %v2709_v15, %v4682_v28  ;;  %v2336_v12 = vmul.f32 -1.442695, %v4741_v37 }
 0x1b0   :  { %v2711_v2 = vpop.eup %2710  ;;  %v1850_v59 = vadd.f32 %v1849_v56, %v4599_v53  ;;  %v1495_v48 = vand.u32 2147483648, %v4623_v14  ;;  %v1725_v26 = vmul.f32 %v4743_v42, %v4665_v41  ;;  %2714 = vpow2.f32 %v2335_v19 }
 0x1b1   :  { %v1482_v46 = vsel %vm4696_vm12, %v1481_v34, %v1477_v47  ;;  %v1021_v29 = vsub.f32 1.0, %v1020_v11  ;;  %v4773_v32 = vadd.f32 1.0, %v2711_v2  ;;  %2716 = vpow2.f32 %v2336_v12 }
 0x1b2   :  { %v1717_v33 = vsel %vm4759_vm8, %v4625_v30, %v1713_v38  ;;  %v1768_v39 = vmul.f32 %v1017_v22, %v4398_v9  ;;  %v1487_v53 = vmul.f32 %v4684_v16, %v1486_v51  ;;  %vm4780_vm7 = vcmp.eq.f32.partialorder %v1493_v8, 8.507059e+37 }
 0x1b3   :  { %v1030_v13 = vand.u32 2147483648, %v4682_v28  ;;  %v1022_v40 = vmul.f32 %v2709_v15, %v1021_v29  ;;  %vm1025_vm9 = vweird.f32 %v2709_v15  ;;  %v1028_v34 = vand.u32 2147483647, %v4682_v28 }
 0x1b4   :  { %2718 = vrcp.f32 %v4773_v32  ;;  %v2713_v61 = vpop.eup %2712  ;;  %vm1490_vm10 = vweird.f32 %v4684_v16  ;;  %v1726_v30 = vsub.f32 1.0, %v1725_v26  ;;  %vm1729_vm11 = vweird.f32 %v4665_v41 }
 0x1b5   :  { %v1733_v9 = vand.u32 2147483647, %v4665_v41  ;;  %v1799_v57 = vmul.f32 %v1482_v46, %v4377_v49  ;;  %v1023_v27 = vadd.f32 %v2709_v15, %v1022_v40  ;;  %vm1024_vm12 = vweird.f32 %v4682_v28  ;;  %vm4803_vm14 = vmor %vm1489_vm5, %vm1490_vm10 }
 0x1b6   :  { %v4792_v56 = vadd.f32 1.0, %v2713_v61  ;;  %v2715_v38 = vpop.eup %2714  ;;  %v1722_v8 = vsel %vm4719_vm2, %v1721_v58, %v1717_v33  ;;  %v1488_v47 = vadd.f32 %v4684_v16, %v1487_v53  ;;  %v1496_v51 = vor.u32 1.1754944e-38, %v1495_v48  ;;  %vm1026_vm13 = vmor %vm1024_vm12, %vm1025_vm9 }
 0x1b7   :  { %v1031_v19 = vor.u32 1.1754944e-38, %v1030_v13  ;;  %v2717_v4 = vpop.eup %2716  ;;  %v1851_v22 = vsel %vm26_vm0, %v1768_v39, 0.0  ;;  %v1027_v28 = vsel %vm1026_vm13, %v2709_v15, %v1023_v27  ;;  %vm1029_vm15 = vcmp.eq.f32.partialorder %v1028_v34, 8.507059e+37 }
 0x1b8   :  { %2720 = vrcp.f32 %v4792_v56  ;;  %v1727_v58 = vmul.f32 %v4743_v42, %v1726_v30  ;;  %v4809_v11 = vadd.f32 1.0, %v2715_v38  ;;  %vm1730_vm1 = vweird.f32 %v4743_v42 }
 0x1b9   :  { %v1032_v18 = vsel %vm1029_vm15, %v1031_v19, %v1027_v28  ;;  %v1735_v2 = vand.u32 2147483648, %v4665_v41  ;;  %v2754_v48 = vmov 0.0   ;;  %v4817_v15 = vadd.f32 1.0, %v2717_v4  ;;  %vm4845_vm2 = vmor %vm1729_vm11, %vm1730_vm1 }
 0x1ba   :  { %v4811_v12 = vpop.eup %2718  ;;  %v1769_v14 = vmul.f32 %v1032_v18, %v4557_v24  ;;  %27 = vst.msk [vmem:[#allocation2] sm:$0xff] %vm26_vm0, %v2754_v48  ;;  %v1852_v26 = vadd.f32 %v1851_v22, %v1850_v59  ;;  %v1492_v46 = vsel %vm4803_vm14, %v4684_v16, %v1488_v47  ;;  %2722 = vrcp.f32 %v4809_v11 }
 0x1bb   :  { %v1500_v29 = vmul.f32 %v4811_v12, %v4773_v32  ;;  %v4826_v33 = vmul.f32 %v1272_v52, %v4351_v36  ;;  %v4829_v24 = vsel %vm26_vm0, %v1799_v57, 0.0  ;;  %v4832_v39 = vmul.f32 %v1722_v8, %v4395_v31 }
 0x1bc   :  { %v1853_v59 = vsel %vm26_vm0, %v1769_v14, 0.0  ;;  %v1728_v53 = vadd.f32 %v4743_v42, %v1727_v58  ;;  %2724 = vrcp.f32 %v4817_v15  ;;  %v1497_v36 = vsel %vm4780_vm7, %v1496_v51, %v1492_v46 }
 0x1bd   :  { %v1854_v13 = vadd.f32 %v1853_v59, %v1852_v26  ;;  %v1501_v16 = vsub.f32 1.0, %v1500_v29  ;;  %vm4849_vm3 = vcmp.eq.f32.partialorder %v1733_v9, 8.507059e+37  ;;  %v1736_v34 = vor.u32 1.1754944e-38, %v1735_v2 }
 0x1be   :  { %v4837_v40 = vpop.eup %2720  ;;  %v1508_v61 = vand.u32 2147483647, %v4773_v32  ;;  %v1510_v43 = vand.u32 2147483648, %v4773_v32  ;;  %vm1995_vm4 = vcmask 1041409   ;;  %vm1504_vm5 = vweird.f32 %v4773_v32 }
 0x1bf   :  { %v1855_v30 = vrot.slane %v1854_v13, 4  ;;  %v1502_v57 = vmul.f32 %v4811_v12, %v1501_v16  ;;  %v1740_v27 = vmul.f32 %v4837_v40, %v4792_v56  ;;  %vm1505_vm8 = vweird.f32 %v4811_v12 }
 0x1c0   :  { %v1748_v41 = vand.u32 2147483647, %v4792_v56  ;;  %v1750_v9 = vand.u32 2147483648, %v4792_v56  ;;  %v2723_v38 = vpop.eup %2722  ;;  %v4863_v8 = vmul.f32 %v1497_v36, %v4460_v21  ;;  %v1732_v47 = vsel %vm4845_vm2, %v4743_v42, %v1728_v53  ;;  %vm4878_vm12 = vmor %vm1504_vm5, %vm1505_vm8 }
 0x1c1   :  { %v1856_v51 = vadd.f32 %v1855_v30, %v1854_v13  ;;  %v1741_v19 = vsub.f32 1.0, %v1740_v27  ;;  %v1503_v4 = vadd.f32 %v4811_v12, %v1502_v57  ;;  %vm1744_vm7 = vweird.f32 %v4792_v56  ;;  %v2393_v57 = vld [vmem:[%s5045_s3 + $0x8] sm:$0xf] }
 0x1c2   :  { %vm1745_vm9 = vweird.f32 %v4837_v40  ;;  %v1035_v22 = vmul.f32 %v2723_v38, %v4809_v11  ;;  %v2725_v49 = vpop.eup %2724  ;;  %vm1144_vm10 = vweird.f32 %v3562_v62  ;;  %vm1145_vm11 = vweird.f32 %v3625_v3 }
 0x1c3   :  { %v1857_v21 = vrot.slane %v1856_v51, 2  ;;  %vm4882_vm13 = vcmp.eq.f32.partialorder %v1508_v61, 8.507059e+37  ;;  %v1511_v58 = vor.u32 1.1754944e-38, %v1510_v43  ;;  %v1742_v18 = vmul.f32 %v4837_v40, %v1741_v19  ;;  %vm4897_vm15 = vmor %vm1744_vm7, %vm1745_vm9 }
 0x1c4   :  { %vm4887_vm14 = vcmp.eq.f32.partialorder %v1748_v41, 8.507059e+37  ;;  %v1751_v14 = vor.u32 1.1754944e-38, %v1750_v9  ;;  %v1036_v48 = vsub.f32 1.0, %v1035_v22  ;;  %v1050_v26 = vmul.f32 %v2725_v49, %v4817_v15 }
 0x1c5   :  { %v1858_v32 = vadd.f32 %v1857_v21, %v1856_v51  ;;  %v1743_v46 = vadd.f32 %v4837_v40, %v1742_v18  ;;  %v1043_v59 = vand.u32 2147483647, %v4809_v11  ;;  %v1045_v53 = vand.u32 2147483648, %v4809_v11 }
 0x1c6   :  { %v1507_v13 = vsel %vm4878_vm12, %v4811_v12, %v1503_v4  ;;  %v1037_v16 = vmul.f32 %v2723_v38, %v1036_v48  ;;  %vm1040_vm1 = vweird.f32 %v2723_v38  ;;  %v1051_v36 = vsub.f32 1.0, %v1050_v26  ;;  %v5268_v26 = vld [vmem:[#allocation15_spill] sm:$0xff] }
 0x1c7   :  { %v1859_v31 = vrot.slane %v1858_v32, 1  ;;  %vm1039_vm2 = vweird.f32 %v4809_v11  ;;  %v1058_v56 = vand.u32 2147483647, %v4817_v15  ;;  %v1060_v61 = vand.u32 2147483648, %v4817_v15 }
 0x1c8   :  { %v5259_v30 = vand.u32 2147483647, %v3498_v0  ;;  %v1747_v12 = vsel %vm4897_vm15, %v4837_v40, %v1743_v46  ;;  %v1038_v43 = vadd.f32 %v2723_v38, %v1037_v16  ;;  %v1052_v27 = vmul.f32 %v2725_v49, %v1051_v36  ;;  %vm1041_vm9 = vmor %vm1039_vm2, %vm1040_vm1  ;;  %v5274_v36 = vld [vmem:[#allocation16_spill] sm:$0xff] }
 0x1c9   :  { %vm1055_vm8 = vweird.f32 %v2725_v49  ;;  %v5262_v41 = vand.u32 2147483647, %v3562_v62  ;;  %v1737_v0 = vsel %vm4849_vm3, %v1736_v34, %v1732_v47  ;;  %v1860_v9 = vadd.f32 %v1859_v31, %v1858_v32  ;;  %v5270_v32 = vld [vmem:[#allocation17_spill] sm:$0xff] }
 0x1ca   :  { %vm4911_vm5 = vcmp.eq.f32.partialorder %v5259_v30, 8.507059e+37  ;;  %v1512_v51 = vsel %vm4882_vm13, %v1511_v58, %v1507_v13  ;;  %v1046_v19 = vor.u32 1.1754944e-38, %v1045_v53  ;;  %v1042_v40 = vsel %vm1041_vm9, %v2723_v38, %v1038_v43  ;;  %v5273_v13 = vld [vmem:[#allocation14_spill] sm:$0xff]  ;;  %v2387_v30 = vld [vmem:[%s5045_s3 + $0x10] sm:$0xf0] }
 0x1cb   :  { %vm4920_vm7 = vcmp.eq.f32.partialorder %v5262_v41, 8.507059e+37  ;;  %vm1044_vm12 = vcmp.eq.f32.partialorder %v1043_v59, 8.507059e+37  ;;  %v1053_v4 = vadd.f32 %v2725_v49, %v1052_v27  ;;  %vm1054_vm15 = vweird.f32 %v4817_v15  ;;  %v5271_v59 = vld [vmem:[#allocation11_spill] sm:$0xff]  ;;  %v5275_v43 = vld [vmem:[#allocation10_spill] sm:$0xff]  ;;  %v5276_v41 = vld [vmem:[#allocation12_spill] sm:$0xff] }
 0x1cc   :  { %v4932_v22 = vsel %vm1995_vm4, %v1860_v9, %v3926_v60  ;;  %v1752_v52 = vsel %vm4887_vm14, %v1751_v14, %v1747_v12  ;;  %v1047_v34 = vsel %vm1044_vm12, %v1046_v19, %v1042_v40  ;;  %vm1056_vm3 = vmor %vm1054_vm15, %vm1055_vm8  ;;  %v1061_v47 = vor.u32 1.1754944e-38, %v1060_v61  ;;  %v2456_v12 = vld [vmem:[%s5045_s3 + $0x14] sm:$0xf0]  ;;  %v5278_v40 = vld [vmem:[#allocation7_spill] sm:$0xff] }
 0x1cd   :  { %v1801_v21 = vmul.f32 %v1512_v51, %v4632_v35  ;;  %v1770_v42 = vmul.f32 %v1047_v34, %v4738_v45  ;;  %v1057_v28 = vsel %vm1056_vm3, %v2725_v49, %v1053_v4  ;;  %vm1059_vm13 = vcmp.eq.f32.partialorder %v1058_v56, 8.507059e+37  ;;  %vm4947_vm4 = vmor %vm1144_vm10, %vm1145_vm11  ;;  %v5277_v51 = vld [vmem:[#allocation13_spill] sm:$0xff] }
 0x1ce   :  { %v1932_v38 = vadd.f32 %v4620_v63, %v4594_v5  ;;  %v1973_v15 = vsel %vm26_vm0, %v4651_v44, 0.0  ;;  %v1816_v60 = vmul.f32 %v1737_v0, %v4539_v23  ;;  %v1062_v58 = vsel %vm1059_vm13, %v1061_v47, %v1057_v28 }
 0x1cf   :  { %v1972_v35 = vadd.f32 %v4597_v20, %v4576_v7  ;;  %v1935_v5 = vsel %vm26_vm0, %v4863_v8, 0.0  ;;  %v1817_v63 = vmul.f32 %v1752_v52, %v4644_v55  ;;  %v1771_v44 = vmul.f32 %v1062_v58, %v4741_v37 }
 0x1d0   :  { %v1894_v23 = vadd.f32 %v4611_v17, %v4579_v10  ;;  %v1895_v62 = vsel %vm26_vm0, %v4826_v33, 0.0  ;;  %v1934_v45 = vadd.f32 %v4829_v24, %v1932_v38  ;;  %v1975_v49 = vsel %vm26_vm0, %v4832_v39, 0.0  ;;  %v5279_v38 = vld [vmem:[#allocation8_spill] sm:$0xff] }
 0x1d1   :  { %v1974_v2 = vadd.f32 %v1973_v15, %v1972_v35  ;;  %v1937_v7 = vsel %vm26_vm0, %v1801_v21, 0.0  ;;  %v1861_v20 = vsel %vm26_vm0, %v1770_v42, 0.0  ;;  %v1862_v55 = vsel %vm26_vm0, %v1771_v44, 0.0 }
 0x1d2   :  { %v1147_v10 = vsel %vm4947_vm4, %v3625_v3, %v3911_v50  ;;  %v1936_v17 = vadd.f32 %v1935_v5, %v1934_v45  ;;  %v1977_v37 = vsel %vm26_vm0, %v1816_v60, 0.0  ;;  %v1863_v33 = vadd.f32 %v1862_v55, %v1861_v20  ;;  %v5269_v50 = vld [vmem:[#allocation9_spill] sm:$0xff] }
 0x1d3   :  { %v1958_v24 = vsel %vm26_vm0, %v3932_v25, 0.0  ;;  %v1896_v39 = vadd.f32 %v1895_v62, %v1894_v23  ;;  %v1976_v8 = vadd.f32 %v1975_v49, %v1974_v2  ;;  %v1979_v14 = vsel %vm26_vm0, %v1817_v63, 0.0  ;;  %v2385_v25 = vld [vmem:[%s5045_s3] sm:$0xf] }
 0x1d4   :  { %v5267_v48 = vsel %vm3679_vm6, %v3559_v1, %v3673_v54  ;;  %v1917_v46 = vadd.f32 %v5270_v32, %v5269_v50  ;;  %v1938_v29 = vadd.f32 %v1937_v7, %v1936_v17  ;;  %v1865_v53 = vadd.f32 %v5271_v59, %v1863_v33  ;;  %v2453_v1 = vld [vmem:[%s5045_s3 + $0x4] sm:$0xf]  ;;  %v5272_v54 = vld [vmem:[#allocation6_spill] sm:$0xff] }
 0x1d5   :  { %v1137_v3 = vsel %vm4911_vm5, %v5268_v26, %v5267_v48  ;;  %v1775_v16 = vmul.f32 %v5273_v13, %v5272_v54  ;;  %v1152_v31 = vsel %vm4920_vm7, %v5274_v36, %v1147_v10  ;;  %v1978_v56 = vadd.f32 %v1977_v37, %v1976_v8  ;;  %v2458_v17 = vld [vmem:[%s5045_s3 + $0x2c] sm:$0xf]  ;;  %v2411_v37 = vld [vmem:[%s5045_s3 + $0x38] sm:$0xf0] }
 0x1d6   :  { %v2386_v61 = vor.u32 %v2455_v6, %v2385_v25  ;;  %v1959_v27 = vadd.f32 %v1958_v24, %v5275_v43  ;;  %v1867_v0 = vadd.f32 %v5276_v41, %v1865_v53  ;;  %v2390_v11 = vor.u32 %v2453_v1, %v2387_v30  ;;  %v2454_v33 = vld [vmem:[%s5045_s3 + $0xc] sm:$0xf]  ;;  %v1818_v41 = vld [vmem:[#allocation2] sm:$0xff] }
 0x1d7   :  { %v2394_v9 = vor.u32 %v2456_v12, %v2393_v57  ;;  %v1868_v19 = vsel %vm26_vm0, %v5277_v51, 0.0  ;;  %v1776_v4 = vmul.f32 %v1137_v3, %v5278_v40  ;;  %v1897_v52 = vrot.slane %v1896_v39, 4 }
 0x1d8   :  { %v1980_v34 = vadd.f32 %v1979_v14, %v1978_v56  ;;  %2086 = vmatpush.bf16.msrb.mxu1 %v2386_v61  ;;  %v1918_v47 = vrot.slane %v1917_v46, 4  ;;  %v1939_v21 = vrot.slane %v1938_v29, 4  ;;  %v1869_v42 = vadd.f32 %v1868_v19, %v1867_v0  ;;  %2099 = vmatpush.bf16.msrb.mxu2 %v2390_v11  ;;  %v2395_v14 = vld [vmem:[%s5045_s3 + $0x18] sm:$0xf0] }
 0x1d9   :  { %2112 = vmatpush.bf16.msrb.mxu3 %v2394_v9  ;;  %v1870_v28 = vsel %vm26_vm0, %v1775_v16, 0.0  ;;  %v1777_v15 = vmul.f32 %v1152_v31, %v5279_v38  ;;  %v1960_v60 = vrot.slane %v1959_v27, 4  ;;  %v1872_v18 = vsel %vm26_vm0, %v1776_v4, 0.0 }
 0x1da   :  { %v1871_v58 = vadd.f32 %v1870_v28, %v1869_v42  ;;  %v1898_v35 = vadd.f32 %v1897_v52, %v1896_v39  ;;  %v1981_v5 = vrot.slane %v1980_v34, 4  ;;  %v1919_v63 = vadd.f32 %v1918_v47, %v1917_v46 }
 0x1db   :  { %v1940_v44 = vadd.f32 %v1939_v21, %v1938_v29  ;;  %v1874_v62 = vsel %vm26_vm0, %v1777_v15, 0.0  ;;  %v1961_v45 = vadd.f32 %v1960_v60, %v1959_v27  ;;  %v2414_v8 = vor.u32 %v2458_v17, %v2411_v37 }
 0x1dc   :  { %v1873_v23 = vadd.f32 %v1872_v18, %v1871_v58  ;;  %v1899_v2 = vrot.slane %v1898_v35, 2  ;;  %v1982_v7 = vadd.f32 %v1981_v5, %v1980_v34  ;;  %v1920_v20 = vrot.slane %v1919_v63, 2 }
 0x1dd   :  { %v1941_v55 = vrot.slane %v1940_v44, 2  ;;  %v1962_v24 = vrot.slane %v1961_v45, 2  ;;  %2124 = vmatpush.bf16.msra.mxu1 %v2414_v8  ;;  %v2398_v32 = vor.u32 %v2454_v33, %v2395_v14  ;;  %vm1997_vm6 = vcmask 1042434  }
 0x1de   :  { %v1875_v49 = vadd.f32 %v1874_v62, %v1873_v23  ;;  %v1900_v48 = vadd.f32 %v1899_v2, %v1898_v35  ;;  %v1983_v26 = vrot.slane %v1982_v7, 2  ;;  %v1921_v3 = vadd.f32 %v1920_v20, %v1919_v63 }
 0x1df   :  { %v1942_v46 = vadd.f32 %v1941_v55, %v1940_v44  ;;  %v1963_v29 = vadd.f32 %v1962_v24, %v1961_v45  ;;  %vm1999_vm10 = vcmask 1043459   ;;  %vm2001_vm11 = vcmask 1044484  }
 0x1e0   :  { %v1876_v10 = vrot.slane %v1875_v49, 4  ;;  %v1901_v53 = vrot.slane %v1900_v48, 1  ;;  %v1984_v25 = vadd.f32 %v1983_v26, %v1982_v7  ;;  %v1922_v6 = vrot.slane %v1921_v3, 1 }
 0x1e1   :  { %2125 = vmatpush.bf16.msra.mxu1 %v2398_v32  ;;  %v1943_v54 = vrot.slane %v1942_v46, 1  ;;  %v1964_v13 = vrot.slane %v1963_v29, 1  ;;  %vm2003_vm14 = vcmask 1045509   ;;  %vm2005_vm1 = vcmask 1046534  }
 0x1e2   :  { %v1877_v39 = vadd.f32 %v1876_v10, %v1875_v49  ;;  %v1902_v36 = vadd.f32 %v1901_v53, %v1900_v48  ;;  %v1985_v31 = vrot.slane %v1984_v25, 1  ;;  %v1923_v56 = vadd.f32 %v1922_v6, %v1921_v3 }
 0x1e3   :  { %v1944_v30 = vadd.f32 %v1943_v54, %v1942_v46  ;;  %v1965_v12 = vadd.f32 %v1964_v13, %v1963_v29  ;;  %vm2007_vm2 = vcmask 1047559  }
 0x1e4   :  { %v1878_v50 = vrot.slane %v1877_v39, 2  ;;  %v1986_v27 = vadd.f32 %v1985_v31, %v1984_v25 }
 0x1e6   :  { %v1879_v59 = vadd.f32 %v1878_v50, %v1877_v39 }
 0x1e8   :  { %v1880_v1 = vrot.slane %v1879_v59, 1 }
 0x1ea   :  { %v1881_v16 = vadd.f32 %v1880_v1, %v1879_v59 }
 0x1ec   :  { %v1998_v61 = vsel %vm1997_vm6, %v1881_v16, %v4932_v22  ;;  %v2026_v22 = vld [vmem:[%s5046_s4] sm:$0xf]  ;;  %s2142_s4 = sshll.u32 %s5047_s5, 4  ;;  %s2143_s4 = int_to_ptr.hbm [resolvable:$true] %s2142_s4 }
 0x1ed   :  { %v2000_v57 = vsel %vm1999_vm10, %v1902_v36, %v1998_v61  ;;  %v2028_v52 = vperm.slane %v2026_v22, 0  ;;  %v2029_v21 = vperm.slane %v2026_v22, 1  ;;  %v2030_v42 = vperm.slane %v2026_v22, 2 }
 0x1ee   :  { %v2002_v43 = vsel %vm2001_vm11, %v1923_v56, %v2000_v57  ;;  %v2031_v18 = vperm.slane %v2026_v22, 3 }
 0x1ef   :  { %v2004_v0 = vsel %vm2003_vm14, %v1944_v30, %v2002_v43 }
 0x1f0   :  { %v2006_v11 = vsel %vm2005_vm1, %v1965_v12, %v2004_v0 }
 0x1f1   :  { %v2008_v9 = vsel %vm2007_vm2, %v1986_v27, %v2006_v11 }
 0x1f2   :  { %v2010_v51 = vadd.f32 %v2008_v9, %v1818_v41 }
 0x1f4   :  { %2011 = vst.msk [vmem:[#allocation2] sm:$0xff] %vm26_vm0, %v2010_v51 }
 0x1fb   :  { %v2015_v19 = vld [vmem:[#allocation2] sm:$0xff] }
 0x1fc   :  { %v2016_v40 = vmul.f32 0.015625, %v2015_v19 }
 0x1fe   :  { %v2017_v4 = vpack.c.bf16 %v2016_v40, %v2016_v40 }
 0x200   :  { %2415 = vmatmul.msk.bf16.vlgmr.msrb.gmra.mxu1 %vm26_vm0, %v2017_v4  ;;  %2416 = vmatmul.msk.bf16.vlgmr.msrb.gmra.mxu2 %vm26_vm0, %v2017_v4 }
 0x201   :  { %2417 = vmatmul.msk.bf16.vlgmr.msrb.gmra.mxu3 %vm26_vm0, %v2017_v4 }
 0x210   :  { %2418 = vmatmul.msk.bf16.vlgmr.msra.gmra.mxu1 %vm26_vm0, %v2017_v4 }
 0x27d   :  { %v2088_v34 = vpop.f32.mrf.mxu1 }
 0x27e   :  { %v2089_v47 = vadd.f32 %v2088_v34, %v2028_v52 }
 0x280   :  { %2131 = vst [vmem:[#allocation3] sm:$0xff] %v2089_v47 }
 0x283   :  { %v2101_v28 = vpop.f32.mrf.mxu2 }
 0x284   :  { %v2102_v38 = vadd.f32 %v2101_v28, %v2029_v21  ;;  %v2114_v15 = vpop.f32.mrf.mxu3 }
 0x285   :  { %v2115_v60 = vadd.f32 %v2114_v15, %v2030_v42  ;;  %v2090_v58 = vpop.f32.mrf.mxu1 }
 0x286   :  { %2132 = vst [vmem:[#allocation3 + $0x8] sm:$0xff] %v2102_v38 }
 0x287   :  { %2133 = vst [vmem:[#allocation3 + $0x10] sm:$0xff] %v2115_v60 }
 0x28b   :  { %v2103_v35 = vpop.f32.mrf.mxu2 }
 0x28c   :  { %v2116_v5 = vpop.f32.mrf.mxu3 }
 0x28d   :  { %v2127_v63 = vpop.f32.mrf.mxu1 }
 0x28e   :  { %v2128_v44 = vadd.f32 %v2127_v63, %v2031_v18 }
 0x290   :  { %2134 = vst [vmem:[#allocation3 + $0x18] sm:$0xff] %v2128_v44 }
 0x291   :  { %2145 = dma.vmem_to_hbm [thread:$0]  %s2141_s19, 512, %s2143_s4, [#allocation4]  }
 0x295   :  { %v2129_v23 = vpop.f32.mrf.mxu1 }
 0x296   :  { %2752 = dma.done.wait [#allocation4], 512  }
 0x297   :  { %2753 = vsyncadd [#allocation4], 4294966784 }
 0x298   :  { %2150 = vsyncpa [#allocation4], 1 }

</bundles_post_ra>
